<compile_context>
chip_gen: v6e
topology: v6e:2x2x1
jax: 0.10.0
libtpu: 0.0.40
codegen_flags: <defaults>
</compile_context>

<pallas_src>
import numpy as np

import jax
import jax.numpy as jnp
from jax.experimental import pallas as pl
from jax.experimental.pallas import tpu as pltpu  # noqa: F401  (memory spaces etc.)


# ----------------------------- fused Pallas kernel ---------------------------

def _make_fused_kernel(mode):
    """Build the fused forward kernel body for a (static) mode."""

    def kernel(p_tok_ref, p_att_ref, h_tok_ref, h_att_ref,
               p_sent_ref, p_masks_ref, h_sent_ref, h_masks_ref,
               sel_p_ref, sel_h_ref, empty_p_ref, empty_h_ref,
               amask_ref, valid_ref,
               w1_ref, b1_ref, w2_ref, b2_ref, w3_ref, b3_ref,
               out_ref):

        # ---- local mean pooling: per-phrase token embeddings (VPU) ----------
        def local_pool(tok, m):                       # tok [B,S,D], m [B,S]
            mm = m[:, :, None]
            num = jnp.sum(tok * mm, axis=1)           # [B, D]
            den = jnp.maximum(jnp.sum(mm, axis=1), 1e-9)   # [B, 1]
            return num * pl.reciprocal(den, approx=True)

        # ---- global mean pooling: shared sentence tokens -> one matmul ------
        def global_pool(masks, sent_tok):             # masks [B,S], tok [S,D]
            num = jnp.dot(masks, sent_tok, preferred_element_type=jnp.float32)
            den = jnp.maximum(jnp.sum(masks, axis=1, keepdims=True), 1e-9)
            return num * pl.reciprocal(den, approx=True)

        local_p = local_pool(p_tok_ref[...], p_att_ref[...])
        local_h = local_pool(h_tok_ref[...], h_att_ref[...])
        global_p = global_pool(p_masks_ref[...], p_sent_ref[...])
        global_h = global_pool(h_masks_ref[...], h_sent_ref[...])

        if mode == "concat":
            emb_p = jnp.concatenate([local_p, global_p], axis=-1)
            emb_h = jnp.concatenate([local_h, global_h], axis=-1)
        elif mode == "local":
            emb_p, emb_h = local_p, local_h
        else:
            emb_p, emb_h = global_p, global_h

        # ---- pair assembly: vectorized one-hot gather (tiny MXU matmuls) ----
        sel_p = sel_p_ref[...]                        # [Npad, num_p + 1]
        sel_h = sel_h_ref[...]                        # [Npad, num_h + 1]
        n_p = emb_p.shape[0]
        n_h = emb_h.shape[0]
        p_batch = (jnp.dot(sel_p[:, :n_p], emb_p,
                           preferred_element_type=jnp.float32)
                   + sel_p[:, n_p:n_p + 1] * empty_p_ref[...])
        h_batch = (jnp.dot(sel_h[:, :n_h], emb_h,
                           preferred_element_type=jnp.float32)
                   + sel_h[:, n_h:n_h + 1] * empty_h_ref[...])

        # ---- MLP: single lane-dense K = 4*Din matmul ------------------------
        feat = jnp.concatenate(
            [p_batch, h_batch, jnp.abs(p_batch - h_batch), p_batch * h_batch],
            axis=-1)                                   # [Npad, 4*Din]
        x = jnp.dot(feat.astype(jnp.bfloat16), w1_ref[...],
                    preferred_element_type=jnp.float32) + b1_ref[...]
        x = jnp.maximum(x, 0.0)                        # ReLU (f32 VPU)
        x = jnp.dot(x.astype(jnp.bfloat16), w2_ref[...],
                    preferred_element_type=jnp.float32) + b2_ref[...]
        x = jnp.maximum(x, 0.0)                        # ReLU (f32 VPU)
        logits = jnp.dot(x, w3_ref[...],
                         preferred_element_type=jnp.float32) + b3_ref[...]

        # softmax over the 3 labels (f32)
        m = jnp.max(logits, axis=-1, keepdims=True)
        e = jnp.exp(logits - m)
        probs = e * pl.reciprocal(jnp.sum(e, axis=-1, keepdims=True),
                                  approx=True)         # [Npad, 3]

        # ---- sentence-level scores (padded rows masked out) -----------------
        valid = valid_ref[...]                         # [Npad, 1] real pair?
        amask = amask_ref[...]                         # [Npad, 1] aligned pair?
        pE = probs[:, 0:1]
        pC = probs[:, 1:2]
        pN = probs[:, 2:3]

        # E = exp(mean(log p_E)) over all real pairs
        n_valid = jnp.sum(valid, keepdims=True)                      # [1,1]
        log_pE = jnp.where(valid > 0.5,
                           jnp.log(jnp.maximum(pE, 1e-30)), 0.0)
        score_E = jnp.exp(jnp.sum(log_pE, keepdims=True)
                          * pl.reciprocal(n_valid, approx=True))     # [1,1]

        # C = max(p_C over aligned pairs), or 0 if no aligned pair
        any_aligned = jnp.max(amask, keepdims=True) > 0.5
        c_max = jnp.max(jnp.where(amask > 0.5, pC, -1.0), keepdims=True)
        score_C = jnp.where(any_aligned, c_max, 0.0)                 # [1,1]

        # N = max(p_N over all real pairs) * (1 - C)
        n_max = jnp.max(jnp.where(valid > 0.5, pN, -1.0), keepdims=True)
        score_N = n_max * (1.0 - score_C)                            # [1,1]

        lane = jax.lax.broadcasted_iota(jnp.int32, (1, 3), 1)
        scores = jnp.where(lane == 0, score_E,
                           jnp.where(lane == 1, score_C, score_N))   # [1,3]
        out_ref[...] = scores * pl.reciprocal(
            jnp.sum(scores, keepdims=True), approx=True)

    return kernel


def _full_spec(shape):
    nd = len(shape)
    return pl.BlockSpec(shape, lambda i, _nd=nd: (0,) * _nd)


def epr_forward_fused(mode, p_tok, p_att, h_tok, h_att,
                      p_sent_tok, p_masks, h_sent_tok, h_masks,
                      sel_p, sel_h, empty_p, empty_h, amask, valid,
                      w1_bf16, b1, w2_bf16, b2, w3, b3):
    """One pallas_call for the whole EPRModel forward. Returns [1, 3]."""
    args = (p_tok, p_att, h_tok, h_att, p_sent_tok, p_masks,
            h_sent_tok, h_masks, sel_p, sel_h, empty_p, empty_h,
            amask, valid, w1_bf16, b1, w2_bf16, b2, w3, b3)
    return pl.pallas_call(
        _make_fused_kernel(mode),
        out_shape=jax.ShapeDtypeStruct((1, 3), jnp.float32),
        grid=(1,),
        in_specs=[_full_spec(a.shape) for a in args],
        out_specs=_full_spec((1, 3)),
    )(*args)


# ------------------------------ model wrapper --------------------------------

class EPRModelPallas:
    """JAX/Pallas re-implementation of EPRModel.forward (induce_sentence_label)."""

    def __init__(self, mode="concat", embed_dim=32, vocab_size=100,
                 hidden_dim1=1024, hidden_dim2=256, key=None):
        if mode not in ("local", "global", "concat"):
            raise ValueError("Invalid mode.")
        self.mode = mode
        self.embed_dim = embed_dim
        self.input_dim = embed_dim * ((mode == "concat") + 1)
        k = jax.random.split(key, 10)

        # Synthetic deterministic "SBert" token-embedding tables (see TODO above).
        self.local_tok_emb = 0.1 * jax.random.normal(
            k[0], (vocab_size, embed_dim), jnp.float32)
        self.global_tok_emb = 0.1 * jax.random.normal(
            k[1], (vocab_size, embed_dim), jnp.float32)

        def linear(kw, kb, fan_in, fan_out):
            bound = 1.0 / (fan_in ** 0.5)            # nn.Linear default init
            w = jax.random.uniform(kw, (fan_in, fan_out), jnp.float32, -bound, bound)
            b = jax.random.uniform(kb, (1, fan_out), jnp.float32, -bound, bound)
            return w, b

        din4 = self.input_dim * 4                     # concat order [p,h,|p-h|,p*h]
        w1, self.b1 = linear(k[2], k[3], din4, hidden_dim1)
        w2, self.b2 = linear(k[4], k[5], hidden_dim1, hidden_dim2)
        self.w3, self.b3 = linear(k[6], k[7], hidden_dim2, 3)
        # bf16 copies for the big MXU matmuls (f32 accumulation in-kernel).
        self.w1_bf16 = w1.astype(jnp.bfloat16)
        self.w2_bf16 = w2.astype(jnp.bfloat16)
        # EmptyToken: nn.Embedding(2, input_dim), default N(0, 1) init.
        self.empty_tokens = jax.random.normal(k[8], (2, self.input_dim), jnp.float32)

    def forward(self, ex):
        p_masks = jnp.asarray(ex["p_masks"], jnp.float32)
        h_masks = jnp.asarray(ex["h_masks"], jnp.float32)
        alignment = ex["alignment"]                   # static python list of (p, h)
        num_p = p_masks.shape[0]
        num_h = h_masks.shape[0]

        # Backbone stand-in: token-embedding lookups (regular XLA gathers).
        p_tok = self.local_tok_emb[ex["p_phrase_tokens"]["input_ids"]]   # [P,S,D]
        h_tok = self.local_tok_emb[ex["h_phrase_tokens"]["input_ids"]]   # [H,S,D]
        p_att = jnp.asarray(ex["p_phrase_tokens"]["attention_mask"], jnp.float32)
        h_att = jnp.asarray(ex["h_phrase_tokens"]["attention_mask"], jnp.float32)
        p_sent_tok = self.global_tok_emb[ex["p_sent_tokens"]["input_ids"]]  # [Ss,D]
        h_sent_tok = self.global_tok_emb[ex["h_sent_tokens"]["input_ids"]]  # [Ss,D]

        # ---- static pair table -> one-hot select matrices (no per-row ops) --
        aligned_p = {int(a[0]) for a in alignment}
        aligned_h = {int(a[1]) for a in alignment}
        rows = []                                     # (p_idx|None, h_idx|None, aligned)
        for p in range(num_p):                        # unaligned premise phrases
            if p not in aligned_p:
                rows.append((p, None, 0.0))
        for h in range(num_h):                        # unaligned hypothesis phrases
            if h not in aligned_h:
                rows.append((None, h, 0.0))
        for p, h in alignment:                        # aligned pairs
            rows.append((int(p), int(h), 1.0))

        n_pairs = len(rows)
        n_pad = max(8, ((n_pairs + 7) // 8) * 8)      # sublane-dense pair batch

        sel_p = np.zeros((n_pad, num_p + 1), np.float32)  # last col = empty token
        sel_h = np.zeros((n_pad, num_h + 1), np.float32)
        amask = np.zeros((n_pad, 1), np.float32)
        valid = np.zeros((n_pad, 1), np.float32)
        for i, (p, h, a) in enumerate(rows):
            sel_p[i, num_p if p is None else p] = 1.0
            sel_h[i, num_h if h is None else h] = 1.0
            amask[i, 0] = a
            valid[i, 0] = 1.0

        sent_probs = epr_forward_fused(
            self.mode,
            p_tok.astype(jnp.float32), p_att,
            h_tok.astype(jnp.float32), h_att,
            p_sent_tok.astype(jnp.float32), p_masks,
            h_sent_tok.astype(jnp.float32), h_masks,
            jnp.asarray(sel_p), jnp.asarray(sel_h),
            self.empty_tokens[0:1], self.empty_tokens[1:2],
            jnp.asarray(amask), jnp.asarray(valid),
            self.w1_bf16, self.b1, self.w2_bf16, self.b2, self.w3, self.b3)
        return sent_probs[0]                          # [3] : (E, C, N)


# ---------------------------------- main --------------------------------------

if __name__ == "__main__":
    key = jax.random.PRNGKey(0)
    k_model, k_data = jax.random.split(key)
    model = EPRModelPallas(mode="concat", embed_dim=32, vocab_size=100, key=k_model)

    num_p, num_h = 3, 4
    seq_phrase, seq_sent, vocab = 8, 16, 100
    kd = jax.random.split(k_data, 4)

    def length_mask(lengths, seq):
        l = jnp.asarray(lengths, jnp.int32)[:, None]
        return (jnp.arange(seq)[None, :] < l).astype(jnp.float32)

    def span_masks(spans, seq):
        pos = jnp.arange(seq)
        return jnp.stack([((pos >= s) & (pos < e)).astype(jnp.float32)
                          for s, e in spans])

    ex = {
        "p_phrase_tokens": {
            "input_ids": jax.random.randint(kd[0], (num_p, seq_phrase), 0, vocab),
            "attention_mask": length_mask([8, 5, 6], seq_phrase),
        },
        "h_phrase_tokens": {
            "input_ids": jax.random.randint(kd[1], (num_h, seq_phrase), 0, vocab),
            "attention_mask": length_mask([7, 8, 4, 6], seq_phrase),
        },
        "p_sent_tokens": {"input_ids": jax.random.randint(kd[2], (seq_sent,), 0, vocab)},
        "h_sent_tokens": {"input_ids": jax.random.randint(kd[3], (seq_sent,), 0, vocab)},
        "p_masks": span_masks([(0, 5), (5, 10), (10, 16)], seq_sent),
        "h_masks": span_masks([(0, 4), (4, 8), (8, 12), (12, 16)], seq_sent),
        "alignment": [(0, 1), (2, 3)],
    }

    sent_probs = model.forward(ex)
    sent_probs = jax.block_until_ready(sent_probs)
    assert sent_probs.shape == (3,)
    print("KERNEL_OK")
</pallas_src>

<mosaic_0001>
module attributes {stable_mosaic.version = 11 : i64} {
  func.func @kernel(%arg0: i32, %arg1: memref<3x8x32xf32, #tpu.memory_space<vmem>>, %arg2: memref<3x8xf32, #tpu.memory_space<vmem>>, %arg3: memref<4x8x32xf32, #tpu.memory_space<vmem>>, %arg4: memref<4x8xf32, #tpu.memory_space<vmem>>, %arg5: memref<16x32xf32, #tpu.memory_space<vmem>>, %arg6: memref<3x16xf32, #tpu.memory_space<vmem>>, %arg7: memref<16x32xf32, #tpu.memory_space<vmem>>, %arg8: memref<4x16xf32, #tpu.memory_space<vmem>>, %arg9: memref<8x4xf32, #tpu.memory_space<vmem>>, %arg10: memref<8x5xf32, #tpu.memory_space<vmem>>, %arg11: memref<1x64xf32, #tpu.memory_space<vmem>>, %arg12: memref<1x64xf32, #tpu.memory_space<vmem>>, %arg13: memref<8x1xf32, #tpu.memory_space<vmem>>, %arg14: memref<8x1xf32, #tpu.memory_space<vmem>>, %arg15: memref<256x1024xbf16, #tpu.memory_space<vmem>>, %arg16: memref<1x1024xf32, #tpu.memory_space<vmem>>, %arg17: memref<1024x256xbf16, #tpu.memory_space<vmem>>, %arg18: memref<1x256xf32, #tpu.memory_space<vmem>>, %arg19: memref<256x3xf32, #tpu.memory_space<vmem>>, %arg20: memref<1x3xf32, #tpu.memory_space<vmem>>, %arg21: memref<1x3xf32, #tpu.memory_space<vmem>>) attributes {dimension_semantics = [#tpu.dimension_semantics<arbitrary>], iteration_bounds = array<i64: 1>, scalar_prefetch = 0 : i64, scratch_operands = 0 : i64, tpu.core_type = #tpu.core_type<tc>, window_params = [{pipeline_mode = #tpu.pipeline_mode<synchronous>, transform_indices = @transform_0, window_bounds = array<i64: 3, 8, 32>}, {pipeline_mode = #tpu.pipeline_mode<synchronous>, transform_indices = @transform_1, window_bounds = array<i64: 3, 8>}, {pipeline_mode = #tpu.pipeline_mode<synchronous>, transform_indices = @transform_2, window_bounds = array<i64: 4, 8, 32>}, {pipeline_mode = #tpu.pipeline_mode<synchronous>, transform_indices = @transform_3, window_bounds = array<i64: 4, 8>}, {pipeline_mode = #tpu.pipeline_mode<synchronous>, transform_indices = @transform_4, window_bounds = array<i64: 16, 32>}, {pipeline_mode = #tpu.pipeline_mode<synchronous>, transform_indices = @transform_5, window_bounds = array<i64: 3, 16>}, {pipeline_mode = #tpu.pipeline_mode<synchronous>, transform_indices = @transform_6, window_bounds = array<i64: 16, 32>}, {pipeline_mode = #tpu.pipeline_mode<synchronous>, transform_indices = @transform_7, window_bounds = array<i64: 4, 16>}, {pipeline_mode = #tpu.pipeline_mode<synchronous>, transform_indices = @transform_8, window_bounds = array<i64: 8, 4>}, {pipeline_mode = #tpu.pipeline_mode<synchronous>, transform_indices = @transform_9, window_bounds = array<i64: 8, 5>}, {pipeline_mode = #tpu.pipeline_mode<synchronous>, transform_indices = @transform_10, window_bounds = array<i64: 1, 64>}, {pipeline_mode = #tpu.pipeline_mode<synchronous>, transform_indices = @transform_11, window_bounds = array<i64: 1, 64>}, {pipeline_mode = #tpu.pipeline_mode<synchronous>, transform_indices = @transform_12, window_bounds = array<i64: 8, 1>}, {pipeline_mode = #tpu.pipeline_mode<synchronous>, transform_indices = @transform_13, window_bounds = array<i64: 8, 1>}, {pipeline_mode = #tpu.pipeline_mode<synchronous>, transform_indices = @transform_14, window_bounds = array<i64: 256, 1024>}, {pipeline_mode = #tpu.pipeline_mode<synchronous>, transform_indices = @transform_15, window_bounds = array<i64: 1, 1024>}, {pipeline_mode = #tpu.pipeline_mode<synchronous>, transform_indices = @transform_16, window_bounds = array<i64: 1024, 256>}, {pipeline_mode = #tpu.pipeline_mode<synchronous>, transform_indices = @transform_17, window_bounds = array<i64: 1, 256>}, {pipeline_mode = #tpu.pipeline_mode<synchronous>, transform_indices = @transform_18, window_bounds = array<i64: 256, 3>}, {pipeline_mode = #tpu.pipeline_mode<synchronous>, transform_indices = @transform_19, window_bounds = array<i64: 1, 3>}, {pipeline_mode = #tpu.pipeline_mode<synchronous>, transform_indices = @transform_20, window_bounds = array<i64: 1, 3>}]} {
    %c0 = arith.constant 0 : index
    %c0_0 = arith.constant 0 : index
    %c0_1 = arith.constant 0 : index
    %0 = vector.load %arg1[%c0, %c0_0, %c0_1] : memref<3x8x32xf32, #tpu.memory_space<vmem>>, vector<3x8x32xf32>
    %c0_2 = arith.constant 0 : index
    %c0_3 = arith.constant 0 : index
    %1 = vector.load %arg2[%c0_2, %c0_3] : memref<3x8xf32, #tpu.memory_space<vmem>>, vector<3x8xf32>
    %2 = vector.shape_cast %1 : vector<3x8xf32> to vector<3x8x1xf32>
    %3 = vector.broadcast %2 : vector<3x8x1xf32> to vector<3x8x32xf32>
    %4 = arith.mulf %0, %3 : vector<3x8x32xf32>
    %cst = arith.constant dense<0.000000e+00> : vector<3x32xf32>
    %5 = vector.multi_reduction <add>, %4, %cst [1] : vector<3x8x32xf32> to vector<3x32xf32>
    %cst_4 = arith.constant dense<0.000000e+00> : vector<3x1xf32>
    %6 = vector.multi_reduction <add>, %2, %cst_4 [1] : vector<3x8x1xf32> to vector<3x1xf32>
    %cst_5 = arith.constant 9.99999971E-10 : f32
    %7 = vector.broadcast %cst_5 : f32 to vector<3x1xf32>
    %8 = arith.maximumf %6, %7 : vector<3x1xf32>
    %9 = tpu.reciprocal %8 {approx = true} : vector<3x1xf32> -> vector<3x1xf32>
    %10 = vector.broadcast %9 : vector<3x1xf32> to vector<3x32xf32>
    %11 = arith.mulf %5, %10 : vector<3x32xf32>
    %c0_6 = arith.constant 0 : index
    %c0_7 = arith.constant 0 : index
    %c0_8 = arith.constant 0 : index
    %12 = vector.load %arg3[%c0_6, %c0_7, %c0_8] : memref<4x8x32xf32, #tpu.memory_space<vmem>>, vector<4x8x32xf32>
    %c0_9 = arith.constant 0 : index
    %c0_10 = arith.constant 0 : index
    %13 = vector.load %arg4[%c0_9, %c0_10] : memref<4x8xf32, #tpu.memory_space<vmem>>, vector<4x8xf32>
    %14 = vector.shape_cast %13 : vector<4x8xf32> to vector<4x8x1xf32>
    %15 = vector.broadcast %14 : vector<4x8x1xf32> to vector<4x8x32xf32>
    %16 = arith.mulf %12, %15 : vector<4x8x32xf32>
    %cst_11 = arith.constant dense<0.000000e+00> : vector<4x32xf32>
    %17 = vector.multi_reduction <add>, %16, %cst_11 [1] : vector<4x8x32xf32> to vector<4x32xf32>
    %cst_12 = arith.constant dense<0.000000e+00> : vector<4x1xf32>
    %18 = vector.multi_reduction <add>, %14, %cst_12 [1] : vector<4x8x1xf32> to vector<4x1xf32>
    %cst_13 = arith.constant 9.99999971E-10 : f32
    %19 = vector.broadcast %cst_13 : f32 to vector<4x1xf32>
    %20 = arith.maximumf %18, %19 : vector<4x1xf32>
    %21 = tpu.reciprocal %20 {approx = true} : vector<4x1xf32> -> vector<4x1xf32>
    %22 = vector.broadcast %21 : vector<4x1xf32> to vector<4x32xf32>
    %23 = arith.mulf %17, %22 : vector<4x32xf32>
    %c0_14 = arith.constant 0 : index
    %c0_15 = arith.constant 0 : index
    %24 = vector.load %arg6[%c0_14, %c0_15] : memref<3x16xf32, #tpu.memory_space<vmem>>, vector<3x16xf32>
    %c0_16 = arith.constant 0 : index
    %c0_17 = arith.constant 0 : index
    %25 = vector.load %arg5[%c0_16, %c0_17] : memref<16x32xf32, #tpu.memory_space<vmem>>, vector<16x32xf32>
    %cst_18 = arith.constant dense<0.000000e+00> : vector<3x32xf32>
    %26 = tpu.matmul %24, %25, %cst_18 {dimension_numbers = #tpu.dot_dimension_numbers<[1], [0], [0], [1], [0, 0, 1, 1], [], []>} : vector<3x16xf32>, vector<16x32xf32>, vector<3x32xf32> -> vector<3x32xf32>
    %cst_19 = arith.constant dense<0.000000e+00> : vector<3xf32>
    %27 = vector.multi_reduction <add>, %24, %cst_19 [1] : vector<3x16xf32> to vector<3xf32>
    %28 = vector.shape_cast %27 : vector<3xf32> to vector<3x1xf32>
    %cst_20 = arith.constant 9.99999971E-10 : f32
    %29 = vector.broadcast %cst_20 : f32 to vector<3x1xf32>
    %30 = arith.maximumf %28, %29 : vector<3x1xf32>
    %31 = tpu.reciprocal %30 {approx = true} : vector<3x1xf32> -> vector<3x1xf32>
    %32 = vector.broadcast %31 : vector<3x1xf32> to vector<3x32xf32>
    %33 = arith.mulf %26, %32 : vector<3x32xf32>
    %c0_21 = arith.constant 0 : index
    %c0_22 = arith.constant 0 : index
    %34 = vector.load %arg8[%c0_21, %c0_22] : memref<4x16xf32, #tpu.memory_space<vmem>>, vector<4x16xf32>
    %c0_23 = arith.constant 0 : index
    %c0_24 = arith.constant 0 : index
    %35 = vector.load %arg7[%c0_23, %c0_24] : memref<16x32xf32, #tpu.memory_space<vmem>>, vector<16x32xf32>
    %cst_25 = arith.constant dense<0.000000e+00> : vector<4x32xf32>
    %36 = tpu.matmul %34, %35, %cst_25 {dimension_numbers = #tpu.dot_dimension_numbers<[1], [0], [0], [1], [0, 0, 1, 1], [], []>} : vector<4x16xf32>, vector<16x32xf32>, vector<4x32xf32> -> vector<4x32xf32>
    %cst_26 = arith.constant dense<0.000000e+00> : vector<4xf32>
    %37 = vector.multi_reduction <add>, %34, %cst_26 [1] : vector<4x16xf32> to vector<4xf32>
    %38 = vector.shape_cast %37 : vector<4xf32> to vector<4x1xf32>
    %cst_27 = arith.constant 9.99999971E-10 : f32
    %39 = vector.broadcast %cst_27 : f32 to vector<4x1xf32>
    %40 = arith.maximumf %38, %39 : vector<4x1xf32>
    %41 = tpu.reciprocal %40 {approx = true} : vector<4x1xf32> -> vector<4x1xf32>
    %42 = vector.broadcast %41 : vector<4x1xf32> to vector<4x32xf32>
    %43 = arith.mulf %36, %42 : vector<4x32xf32>
    %44 = tpu.concatenate %11, %33 in 1 : vector<3x32xf32>, vector<3x32xf32> -> vector<3x64xf32>
    %45 = tpu.concatenate %23, %43 in 1 : vector<4x32xf32>, vector<4x32xf32> -> vector<4x64xf32>
    %c0_28 = arith.constant 0 : index
    %c0_29 = arith.constant 0 : index
    %46 = vector.load %arg9[%c0_28, %c0_29] : memref<8x4xf32, #tpu.memory_space<vmem>>, vector<8x4xf32>
    %c0_30 = arith.constant 0 : index
    %c0_31 = arith.constant 0 : index
    %47 = vector.load %arg10[%c0_30, %c0_31] : memref<8x5xf32, #tpu.memory_space<vmem>>, vector<8x5xf32>
    %48 = vector.extract_strided_slice %46 {offsets = [0, 0], sizes = [8, 3], strides = [1, 1]} : vector<8x4xf32> to vector<8x3xf32>
    %cst_32 = arith.constant dense<0.000000e+00> : vector<8x64xf32>
    %49 = tpu.matmul %48, %44, %cst_32 {dimension_numbers = #tpu.dot_dimension_numbers<[1], [0], [0], [1], [0, 0, 1, 1], [], []>} : vector<8x3xf32>, vector<3x64xf32>, vector<8x64xf32> -> vector<8x64xf32>
    %50 = vector.extract_strided_slice %46 {offsets = [0, 3], sizes = [8, 1], strides = [1, 1]} : vector<8x4xf32> to vector<8x1xf32>
    %c0_33 = arith.constant 0 : index
    %c0_34 = arith.constant 0 : index
    %51 = vector.load %arg11[%c0_33, %c0_34] : memref<1x64xf32, #tpu.memory_space<vmem>>, vector<1x64xf32>
    %52 = vector.broadcast %50 : vector<8x1xf32> to vector<8x64xf32>
    %53 = vector.broadcast %51 : vector<1x64xf32> to vector<8x64xf32>
    %54 = arith.mulf %52, %53 : vector<8x64xf32>
    %55 = arith.addf %49, %54 : vector<8x64xf32>
    %56 = vector.extract_strided_slice %47 {offsets = [0, 0], sizes = [8, 4], strides = [1, 1]} : vector<8x5xf32> to vector<8x4xf32>
    %cst_35 = arith.constant dense<0.000000e+00> : vector<8x64xf32>
    %57 = tpu.matmul %56, %45, %cst_35 {dimension_numbers = #tpu.dot_dimension_numbers<[1], [0], [0], [1], [0, 0, 1, 1], [], []>} : vector<8x4xf32>, vector<4x64xf32>, vector<8x64xf32> -> vector<8x64xf32>
    %58 = vector.extract_strided_slice %47 {offsets = [0, 4], sizes = [8, 1], strides = [1, 1]} : vector<8x5xf32> to vector<8x1xf32>
    %c0_36 = arith.constant 0 : index
    %c0_37 = arith.constant 0 : index
    %59 = vector.load %arg12[%c0_36, %c0_37] : memref<1x64xf32, #tpu.memory_space<vmem>>, vector<1x64xf32>
    %60 = vector.broadcast %58 : vector<8x1xf32> to vector<8x64xf32>
    %61 = vector.broadcast %59 : vector<1x64xf32> to vector<8x64xf32>
    %62 = arith.mulf %60, %61 : vector<8x64xf32>
    %63 = arith.addf %57, %62 : vector<8x64xf32>
    %64 = arith.subf %55, %63 : vector<8x64xf32>
    %65 = math.absf %64 : vector<8x64xf32>
    %66 = arith.mulf %55, %63 : vector<8x64xf32>
    %67 = tpu.concatenate %55, %63, %65, %66 in 1 : vector<8x64xf32>, vector<8x64xf32>, vector<8x64xf32>, vector<8x64xf32> -> vector<8x256xf32>
    %68 = arith.truncf %67 : vector<8x256xf32> to vector<8x256xbf16>
    %c0_38 = arith.constant 0 : index
    %c0_39 = arith.constant 0 : index
    %69 = vector.load %arg15[%c0_38, %c0_39] : memref<256x1024xbf16, #tpu.memory_space<vmem>>, vector<256x1024xbf16>
    %cst_40 = arith.constant dense<0.000000e+00> : vector<8x1024xf32>
    %70 = tpu.matmul %68, %69, %cst_40 {dimension_numbers = #tpu.dot_dimension_numbers<[1], [0], [0], [1], [0, 0, 1, 1], [], []>} : vector<8x256xbf16>, vector<256x1024xbf16>, vector<8x1024xf32> -> vector<8x1024xf32>
    %c0_41 = arith.constant 0 : index
    %c0_42 = arith.constant 0 : index
    %71 = vector.load %arg16[%c0_41, %c0_42] : memref<1x1024xf32, #tpu.memory_space<vmem>>, vector<1x1024xf32>
    %72 = vector.broadcast %71 : vector<1x1024xf32> to vector<8x1024xf32>
    %73 = arith.addf %70, %72 : vector<8x1024xf32>
    %cst_43 = arith.constant 0.000000e+00 : f32
    %74 = vector.broadcast %cst_43 : f32 to vector<8x1024xf32>
    %75 = arith.maximumf %73, %74 : vector<8x1024xf32>
    %76 = arith.truncf %75 : vector<8x1024xf32> to vector<8x1024xbf16>
    %c0_44 = arith.constant 0 : index
    %c0_45 = arith.constant 0 : index
    %77 = vector.load %arg17[%c0_44, %c0_45] : memref<1024x256xbf16, #tpu.memory_space<vmem>>, vector<1024x256xbf16>
    %cst_46 = arith.constant dense<0.000000e+00> : vector<8x256xf32>
    %78 = tpu.matmul %76, %77, %cst_46 {dimension_numbers = #tpu.dot_dimension_numbers<[1], [0], [0], [1], [0, 0, 1, 1], [], []>} : vector<8x1024xbf16>, vector<1024x256xbf16>, vector<8x256xf32> -> vector<8x256xf32>
    %c0_47 = arith.constant 0 : index
    %c0_48 = arith.constant 0 : index
    %79 = vector.load %arg18[%c0_47, %c0_48] : memref<1x256xf32, #tpu.memory_space<vmem>>, vector<1x256xf32>
    %80 = vector.broadcast %79 : vector<1x256xf32> to vector<8x256xf32>
    %81 = arith.addf %78, %80 : vector<8x256xf32>
    %cst_49 = arith.constant 0.000000e+00 : f32
    %82 = vector.broadcast %cst_49 : f32 to vector<8x256xf32>
    %83 = arith.maximumf %81, %82 : vector<8x256xf32>
    %c0_50 = arith.constant 0 : index
    %c0_51 = arith.constant 0 : index
    %84 = vector.load %arg19[%c0_50, %c0_51] : memref<256x3xf32, #tpu.memory_space<vmem>>, vector<256x3xf32>
    %cst_52 = arith.constant dense<0.000000e+00> : vector<8x3xf32>
    %85 = tpu.matmul %83, %84, %cst_52 {dimension_numbers = #tpu.dot_dimension_numbers<[1], [0], [0], [1], [0, 0, 1, 1], [], []>} : vector<8x256xf32>, vector<256x3xf32>, vector<8x3xf32> -> vector<8x3xf32>
    %c0_53 = arith.constant 0 : index
    %c0_54 = arith.constant 0 : index
    %86 = vector.load %arg20[%c0_53, %c0_54] : memref<1x3xf32, #tpu.memory_space<vmem>>, vector<1x3xf32>
    %87 = vector.broadcast %86 : vector<1x3xf32> to vector<8x3xf32>
    %88 = arith.addf %85, %87 : vector<8x3xf32>
    %cst_55 = arith.constant dense<0xFF800000> : vector<8xf32>
    %89 = vector.multi_reduction <maximumf>, %88, %cst_55 [1] : vector<8x3xf32> to vector<8xf32>
    %90 = vector.shape_cast %89 : vector<8xf32> to vector<8x1xf32>
    %91 = vector.broadcast %90 : vector<8x1xf32> to vector<8x3xf32>
    %92 = arith.subf %88, %91 : vector<8x3xf32>
    %93 = math.exp %92 : vector<8x3xf32>
    %cst_56 = arith.constant dense<0.000000e+00> : vector<8xf32>
    %94 = vector.multi_reduction <add>, %93, %cst_56 [1] : vector<8x3xf32> to vector<8xf32>
    %95 = vector.shape_cast %94 : vector<8xf32> to vector<8x1xf32>
    %96 = tpu.reciprocal %95 {approx = true} : vector<8x1xf32> -> vector<8x1xf32>
    %97 = vector.broadcast %96 : vector<8x1xf32> to vector<8x3xf32>
    %98 = arith.mulf %93, %97 : vector<8x3xf32>
    %c0_57 = arith.constant 0 : index
    %c0_58 = arith.constant 0 : index
    %99 = vector.load %arg14[%c0_57, %c0_58] : memref<8x1xf32, #tpu.memory_space<vmem>>, vector<8x1xf32>
    %c0_59 = arith.constant 0 : index
    %c0_60 = arith.constant 0 : index
    %100 = vector.load %arg13[%c0_59, %c0_60] : memref<8x1xf32, #tpu.memory_space<vmem>>, vector<8x1xf32>
    %101 = vector.extract_strided_slice %98 {offsets = [0, 0], sizes = [8, 1], strides = [1, 1]} : vector<8x3xf32> to vector<8x1xf32>
    %102 = vector.extract_strided_slice %98 {offsets = [0, 1], sizes = [8, 1], strides = [1, 1]} : vector<8x3xf32> to vector<8x1xf32>
    %103 = vector.extract_strided_slice %98 {offsets = [0, 2], sizes = [8, 1], strides = [1, 1]} : vector<8x3xf32> to vector<8x1xf32>
    %104 = vector.shape_cast %99 : vector<8x1xf32> to vector<1x8x1xf32>
    %cst_61 = arith.constant dense<0.000000e+00> : vector<1xf32>
    %105 = vector.multi_reduction <add>, %104, %cst_61 [1, 2] : vector<1x8x1xf32> to vector<1xf32>
    %106 = vector.shape_cast %105 : vector<1xf32> to vector<1x1x1xf32>
    %107 = vector.extract %106[0, 0, 0] : f32 from vector<1x1x1xf32>
    %108 = vector.broadcast %107 : f32 to vector<1x1xf32>
    %cst_62 = arith.constant 5.000000e-01 : f32
    %109 = vector.broadcast %cst_62 : f32 to vector<8x1xf32>
    %110 = arith.cmpf ogt, %99, %109 : vector<8x1xf32>
    %cst_63 = arith.constant 1.000000e-30 : f32
    %111 = vector.broadcast %cst_63 : f32 to vector<8x1xf32>
    %112 = arith.maximumf %101, %111 : vector<8x1xf32>
    %113 = math.log %112 : vector<8x1xf32>
    %cst_64 = arith.constant 0.000000e+00 : f32
    %114 = vector.broadcast %cst_64 : f32 to vector<8x1xf32>
    %115 = arith.select %110, %113, %114 : vector<8x1xi1>, vector<8x1xf32>
    %116 = vector.shape_cast %115 : vector<8x1xf32> to vector<1x8x1xf32>
    %cst_65 = arith.constant dense<0.000000e+00> : vector<1xf32>
    %117 = vector.multi_reduction <add>, %116, %cst_65 [1, 2] : vector<1x8x1xf32> to vector<1xf32>
    %118 = vector.shape_cast %117 : vector<1xf32> to vector<1x1x1xf32>
    %119 = vector.extract %118[0, 0, 0] : f32 from vector<1x1x1xf32>
    %120 = vector.broadcast %119 : f32 to vector<1x1xf32>
    %121 = tpu.reciprocal %108 {approx = true} : vector<1x1xf32> -> vector<1x1xf32>
    %122 = arith.mulf %120, %121 : vector<1x1xf32>
    %123 = math.exp %122 : vector<1x1xf32>
    %124 = vector.shape_cast %100 : vector<8x1xf32> to vector<1x8x1xf32>
    %cst_66 = arith.constant dense<0xFF800000> : vector<1xf32>
    %125 = vector.multi_reduction <maximumf>, %124, %cst_66 [1, 2] : vector<1x8x1xf32> to vector<1xf32>
    %126 = vector.shape_cast %125 : vector<1xf32> to vector<1x1x1xf32>
    %127 = vector.extract %126[0, 0, 0] : f32 from vector<1x1x1xf32>
    %128 = vector.broadcast %127 : f32 to vector<1x1xf32>
    %cst_67 = arith.constant 5.000000e-01 : f32
    %129 = vector.broadcast %cst_67 : f32 to vector<1x1xf32>
    %130 = arith.cmpf ogt, %128, %129 : vector<1x1xf32>
    %cst_68 = arith.constant 5.000000e-01 : f32
    %131 = vector.broadcast %cst_68 : f32 to vector<8x1xf32>
    %132 = arith.cmpf ogt, %100, %131 : vector<8x1xf32>
    %cst_69 = arith.constant -1.000000e+00 : f32
    %133 = vector.broadcast %cst_69 : f32 to vector<8x1xf32>
    %134 = arith.select %132, %102, %133 : vector<8x1xi1>, vector<8x1xf32>
    %135 = vector.shape_cast %134 : vector<8x1xf32> to vector<1x8x1xf32>
    %cst_70 = arith.constant dense<0xFF800000> : vector<1xf32>
    %136 = vector.multi_reduction <maximumf>, %135, %cst_70 [1, 2] : vector<1x8x1xf32> to vector<1xf32>
    %137 = vector.shape_cast %136 : vector<1xf32> to vector<1x1x1xf32>
    %138 = vector.extract %137[0, 0, 0] : f32 from vector<1x1x1xf32>
    %139 = vector.broadcast %138 : f32 to vector<1x1xf32>
    %cst_71 = arith.constant 0.000000e+00 : f32
    %140 = vector.broadcast %cst_71 : f32 to vector<1x1xf32>
    %141 = arith.select %130, %139, %140 : vector<1x1xi1>, vector<1x1xf32>
    %cst_72 = arith.constant 5.000000e-01 : f32
    %142 = vector.broadcast %cst_72 : f32 to vector<8x1xf32>
    %143 = arith.cmpf ogt, %99, %142 : vector<8x1xf32>
    %cst_73 = arith.constant -1.000000e+00 : f32
    %144 = vector.broadcast %cst_73 : f32 to vector<8x1xf32>
    %145 = arith.select %143, %103, %144 : vector<8x1xi1>, vector<8x1xf32>
    %146 = vector.shape_cast %145 : vector<8x1xf32> to vector<1x8x1xf32>
    %cst_74 = arith.constant dense<0xFF800000> : vector<1xf32>
    %147 = vector.multi_reduction <maximumf>, %146, %cst_74 [1, 2] : vector<1x8x1xf32> to vector<1xf32>
    %148 = vector.shape_cast %147 : vector<1xf32> to vector<1x1x1xf32>
    %149 = vector.extract %148[0, 0, 0] : f32 from vector<1x1x1xf32>
    %150 = vector.broadcast %149 : f32 to vector<1x1xf32>
    %cst_75 = arith.constant 1.000000e+00 : f32
    %151 = vector.broadcast %cst_75 : f32 to vector<1x1xf32>
    %152 = arith.subf %151, %141 : vector<1x1xf32>
    %153 = arith.mulf %150, %152 : vector<1x1xf32>
    %154 = tpu.iota {dimensions = array<i32: 1>} : vector<1x3xi32>
    %c0_i32 = arith.constant 0 : i32
    %155 = vector.broadcast %c0_i32 : i32 to vector<1x3xi32>
    %156 = arith.cmpi eq, %154, %155 : vector<1x3xi32>
    %c1_i32 = arith.constant 1 : i32
    %157 = vector.broadcast %c1_i32 : i32 to vector<1x3xi32>
    %158 = arith.cmpi eq, %154, %157 : vector<1x3xi32>
    %159 = vector.shape_cast %141 : vector<1x1xf32> to vector<1x1xf32>
    %160 = vector.broadcast %159 : vector<1x1xf32> to vector<1x3xf32>
    %161 = vector.shape_cast %153 : vector<1x1xf32> to vector<1x1xf32>
    %162 = vector.broadcast %161 : vector<1x1xf32> to vector<1x3xf32>
    %163 = arith.select %158, %160, %162 : vector<1x3xi1>, vector<1x3xf32>
    %164 = vector.shape_cast %123 : vector<1x1xf32> to vector<1x1xf32>
    %165 = vector.broadcast %164 : vector<1x1xf32> to vector<1x3xf32>
    %166 = arith.select %156, %165, %163 : vector<1x3xi1>, vector<1x3xf32>
    %167 = vector.shape_cast %166 : vector<1x3xf32> to vector<1x1x3xf32>
    %cst_76 = arith.constant dense<0.000000e+00> : vector<1xf32>
    %168 = vector.multi_reduction <add>, %167, %cst_76 [1, 2] : vector<1x1x3xf32> to vector<1xf32>
    %169 = vector.shape_cast %168 : vector<1xf32> to vector<1x1x1xf32>
    %170 = vector.extract %169[0, 0, 0] : f32 from vector<1x1x1xf32>
    %171 = vector.broadcast %170 : f32 to vector<1x1xf32>
    %172 = tpu.reciprocal %171 {approx = true} : vector<1x1xf32> -> vector<1x1xf32>
    %173 = vector.broadcast %172 : vector<1x1xf32> to vector<1x3xf32>
    %174 = arith.mulf %166, %173 : vector<1x3xf32>
    %c0_77 = arith.constant 0 : index
    %c0_78 = arith.constant 0 : index
    %175 = vector.load %arg21[%c0_77, %c0_78] : memref<1x3xf32, #tpu.memory_space<vmem>>, vector<1x3xf32>
    tpu.vector_store %arg21[%c0_77, %c0_78], %174 {strides = array<i32>} : memref<1x3xf32, #tpu.memory_space<vmem>>, vector<1x3xf32>,
    return
  }
  func.func @transform_0(%arg0: i32) -> (i32, i32, i32) {
    %c0_i32 = arith.constant 0 : i32
    %c0_i32_0 = arith.constant 0 : i32
    %c0_i32_1 = arith.constant 0 : i32
    %c0_i32_2 = arith.constant 0 : i32
    return %c0_i32, %c0_i32_0, %c0_i32_1 : i32, i32, i32
  }
  func.func @transform_1(%arg0: i32) -> (i32, i32) {
    %c0_i32 = arith.constant 0 : i32
    %c0_i32_0 = arith.constant 0 : i32
    %c0_i32_1 = arith.constant 0 : i32
    return %c0_i32, %c0_i32_0 : i32, i32
  }
  func.func @transform_2(%arg0: i32) -> (i32, i32, i32) {
    %c0_i32 = arith.constant 0 : i32
    %c0_i32_0 = arith.constant 0 : i32
    %c0_i32_1 = arith.constant 0 : i32
    %c0_i32_2 = arith.constant 0 : i32
    return %c0_i32, %c0_i32_0, %c0_i32_1 : i32, i32, i32
  }
  func.func @transform_3(%arg0: i32) -> (i32, i32) {
    %c0_i32 = arith.constant 0 : i32
    %c0_i32_0 = arith.constant 0 : i32
    %c0_i32_1 = arith.constant 0 : i32
    return %c0_i32, %c0_i32_0 : i32, i32
  }
  func.func @transform_4(%arg0: i32) -> (i32, i32) {
    %c0_i32 = arith.constant 0 : i32
    %c0_i32_0 = arith.constant 0 : i32
    %c0_i32_1 = arith.constant 0 : i32
    return %c0_i32, %c0_i32_0 : i32, i32
  }
  func.func @transform_5(%arg0: i32) -> (i32, i32) {
    %c0_i32 = arith.constant 0 : i32
    %c0_i32_0 = arith.constant 0 : i32
    %c0_i32_1 = arith.constant 0 : i32
    return %c0_i32, %c0_i32_0 : i32, i32
  }
  func.func @transform_6(%arg0: i32) -> (i32, i32) {
    %c0_i32 = arith.constant 0 : i32
    %c0_i32_0 = arith.constant 0 : i32
    %c0_i32_1 = arith.constant 0 : i32
    return %c0_i32, %c0_i32_0 : i32, i32
  }
  func.func @transform_7(%arg0: i32) -> (i32, i32) {
    %c0_i32 = arith.constant 0 : i32
    %c0_i32_0 = arith.constant 0 : i32
    %c0_i32_1 = arith.constant 0 : i32
    return %c0_i32, %c0_i32_0 : i32, i32
  }
  func.func @transform_8(%arg0: i32) -> (i32, i32) {
    %c0_i32 = arith.constant 0 : i32
    %c0_i32_0 = arith.constant 0 : i32
    %c0_i32_1 = arith.constant 0 : i32
    return %c0_i32, %c0_i32_0 : i32, i32
  }
  func.func @transform_9(%arg0: i32) -> (i32, i32) {
    %c0_i32 = arith.constant 0 : i32
    %c0_i32_0 = arith.constant 0 : i32
    %c0_i32_1 = arith.constant 0 : i32
    return %c0_i32, %c0_i32_0 : i32, i32
  }
  func.func @transform_10(%arg0: i32) -> (i32, i32) {
    %c0_i32 = arith.constant 0 : i32
    %c0_i32_0 = arith.constant 0 : i32
    %c0_i32_1 = arith.constant 0 : i32
    return %c0_i32, %c0_i32_0 : i32, i32
  }
  func.func @transform_11(%arg0: i32) -> (i32, i32) {
    %c0_i32 = arith.constant 0 : i32
    %c0_i32_0 = arith.constant 0 : i32
    %c0_i32_1 = arith.constant 0 : i32
    return %c0_i32, %c0_i32_0 : i32, i32
  }
  func.func @transform_12(%arg0: i32) -> (i32, i32) {
    %c0_i32 = arith.constant 0 : i32
    %c0_i32_0 = arith.constant 0 : i32
    %c0_i32_1 = arith.constant 0 : i32
    return %c0_i32, %c0_i32_0 : i32, i32
  }
  func.func @transform_13(%arg0: i32) -> (i32, i32) {
    %c0_i32 = arith.constant 0 : i32
    %c0_i32_0 = arith.constant 0 : i32
    %c0_i32_1 = arith.constant 0 : i32
    return %c0_i32, %c0_i32_0 : i32, i32
  }
  func.func @transform_14(%arg0: i32) -> (i32, i32) {
    %c0_i32 = arith.constant 0 : i32
    %c0_i32_0 = arith.constant 0 : i32
    %c0_i32_1 = arith.constant 0 : i32
    return %c0_i32, %c0_i32_0 : i32, i32
  }
  func.func @transform_15(%arg0: i32) -> (i32, i32) {
    %c0_i32 = arith.constant 0 : i32
    %c0_i32_0 = arith.constant 0 : i32
    %c0_i32_1 = arith.constant 0 : i32
    return %c0_i32, %c0_i32_0 : i32, i32
  }
  func.func @transform_16(%arg0: i32) -> (i32, i32) {
    %c0_i32 = arith.constant 0 : i32
    %c0_i32_0 = arith.constant 0 : i32
    %c0_i32_1 = arith.constant 0 : i32
    return %c0_i32, %c0_i32_0 : i32, i32
  }
  func.func @transform_17(%arg0: i32) -> (i32, i32) {
    %c0_i32 = arith.constant 0 : i32
    %c0_i32_0 = arith.constant 0 : i32
    %c0_i32_1 = arith.constant 0 : i32
    return %c0_i32, %c0_i32_0 : i32, i32
  }
  func.func @transform_18(%arg0: i32) -> (i32, i32) {
    %c0_i32 = arith.constant 0 : i32
    %c0_i32_0 = arith.constant 0 : i32
    %c0_i32_1 = arith.constant 0 : i32
    return %c0_i32, %c0_i32_0 : i32, i32
  }
  func.func @transform_19(%arg0: i32) -> (i32, i32) {
    %c0_i32 = arith.constant 0 : i32
    %c0_i32_0 = arith.constant 0 : i32
    %c0_i32_1 = arith.constant 0 : i32
    return %c0_i32, %c0_i32_0 : i32, i32
  }
  func.func @transform_20(%arg0: i32) -> (i32, i32) {
    %c0_i32 = arith.constant 0 : i32
    %c0_i32_0 = arith.constant 0 : i32
    %c0_i32_1 = arith.constant 0 : i32
    return %c0_i32, %c0_i32_0 : i32, i32
  }
}

</mosaic_0001>

<bundles_post_ra>
// kernel: tpu_custom_call.1
= control target key start
LH: loop header
LB: loop body
LE: loop exit
PB: predicated region body
PF: predicated region fallthrough
CT: control target
= control target key end

     0   :  { %s3885_s0 = inlined_call_operand.vmem [shape: f32[3,8,32], index: 0, kind: input, shape index: {}]   ;;  %s3886_s1 = inlined_call_operand.vmem [shape: f32[3,8], index: 1, kind: input, shape index: {}]   ;;  %s3887_s2 = inlined_call_operand.vmem [shape: f32[4,8,32], index: 2, kind: input, shape index: {}]   ;;  %s3888_s3 = inlined_call_operand.vmem [shape: f32[4,8], index: 3, kind: input, shape index: {}]   ;;  %s3889_s4 = inlined_call_operand.vmem [shape: f32[16,32], index: 4, kind: input, shape index: {}]   ;;  %s3890_s5 = inlined_call_operand.vmem [shape: f32[3,16], index: 5, kind: input, shape index: {}]   ;;  %s3891_s6 = inlined_call_operand.vmem [shape: f32[16,32], index: 6, kind: input, shape index: {}]   ;;  %s3892_s7 = inlined_call_operand.vmem [shape: f32[4,16], index: 7, kind: input, shape index: {}]   ;;  %s3893_s8 = inlined_call_operand.vmem [shape: f32[8,4], index: 8, kind: input, shape index: {}]   ;;  %s3894_s9 = inlined_call_operand.vmem [shape: f32[8,5], index: 9, kind: input, shape index: {}]   ;;  %s3895_s10 = inlined_call_operand.vmem [shape: f32[1,64], index: 10, kind: input, shape index: {}]   ;;  %s3896_s11 = inlined_call_operand.vmem [shape: f32[1,64], index: 11, kind: input, shape index: {}]   ;;  %s3897_s12 = inlined_call_operand.vmem [shape: f32[8,1], index: 12, kind: input, shape index: {}]   ;;  %s3898_s13 = inlined_call_operand.vmem [shape: f32[8,1], index: 13, kind: input, shape index: {}]   ;;  %s3899_s14 = inlined_call_operand.hbm [shape: bf16[256,1024], index: 14, kind: input, shape index: {}]   ;;  %s3900_s15 = inlined_call_operand.vmem [shape: f32[1,1024], index: 15, kind: input, shape index: {}]   ;;  %s3901_s16 = inlined_call_operand.hbm [shape: bf16[1024,256], index: 16, kind: input, shape index: {}]   ;;  %s3902_s17 = inlined_call_operand.vmem [shape: f32[1,256], index: 17, kind: input, shape index: {}]   ;;  %s3903_s18 = inlined_call_operand.vmem [shape: f32[256,3], index: 18, kind: input, shape index: {}]   ;;  %s3904_s19 = inlined_call_operand.vmem [shape: f32[1,3], index: 19, kind: input, shape index: {}]   ;;  %s3905_s20 = inlined_call_operand.hbm [shape: f32[1,3], index: 20, kind: output, shape index: {}]  }
   0x1   :  { %3909 = sst [smem:[#allocation11_spill]] %s3885_s0 }
   0x2   :  { %3910 = sst [smem:[#allocation12_spill]] %s3886_s1 }
   0x3   :  { %3911 = sst [smem:[#allocation13_spill]] %s3887_s2 }
   0x4   :  { %3912 = sst [smem:[#allocation14_spill]] %s3888_s3 }
   0x5   :  { %3913 = sst [smem:[#allocation15_spill]] %s3889_s4 }
   0x6   :  { %25 = vsyncpa [#allocation3], 0 }
   0x7   :  { %26 = vsyncpa [#allocation6], 0 }
   0x8   :  { %27 = vsyncpa [#allocation4], 0  ;;  %s3494_s1 = smov [#allocation2]  }
   0x9   :  { %s61_s22 = sshll.u32 %s3494_s1, 4  ;;  %s62_s22 = int_to_ptr.vmem [resolvable:$true] %s61_s22 }
   0xa   :  { %s3436_s23 = scalar_lea.vmem %s62_s22, 16384  ;;  %p3441_p1 = scmp.lt.s32.totalorder %s62_s22, %s62_s22 }
   0xb   :  { %p3437_p0 = scmp.ne.s32.totalorder %s62_s22, %s3436_s23  ;;  %p3442_p2 = scmp.lt.s32.totalorder %s3436_s23, %s3436_s23 }
   0xd   :  { %p3443_p3 = por %p3442_p2, %p3441_p1 }
   0xf   :  { %p3444_p4 = pnand %p3443_p3, %p3437_p0 }
  0x11   :  { %3447 = shalt.err (!%p3444_p4)
}
  0x12   :  { %s3495_s24 = smov 512   ;;  %s3496_s2 = smov 32  }
  0x13   :  { %67 = dma.hbm_to_vmem [thread:$0]  %s3899_s14, 16384, %s62_s22, [#allocation3], %s3495_s24, %s3495_s24, %s3496_s2  }
  0x14   :  { %s3497_s26 = smov [#allocation5]  }
  0x15   :  { %s75_s27 = sshll.u32 %s3497_s26, 4  ;;  %s76_s27 = int_to_ptr.vmem [resolvable:$true] %s75_s27 }
  0x16   :  { %s3456_s28 = scalar_lea.vmem %s76_s27, 16384  ;;  %p3461_p6 = scmp.lt.s32.totalorder %s76_s27, %s76_s27 }
  0x17   :  { %p3457_p5 = scmp.ne.s32.totalorder %s76_s27, %s3456_s28  ;;  %p3462_p7 = scmp.lt.s32.totalorder %s3456_s28, %s3456_s28 }
  0x19   :  { %p3463_p8 = por %p3462_p7, %p3461_p6 }
  0x1b   :  { %p3464_p9 = pnand %p3463_p8, %p3457_p5 }
  0x1d   :  { %3467 = shalt.err (!%p3464_p9)
}
  0x1e   :  { %s3498_s4 = smov 128   ;;  %s3499_s29 = smov 8  }
  0x1f   :  { %81 = dma.hbm_to_vmem [thread:$0]  %s3901_s16, 16384, %s76_s27, [#allocation6], %s3498_s4, %s3498_s4, %s3499_s29  }
  0x20   :  { %3488 = dma.done.wait [#allocation3], 16384  }
  0x21   :  { %3489 = vsyncadd [#allocation3], 4294950912 }
  0x22   :  { %3490 = dma.done.wait [#allocation6], 16384  }
  0x23   :  { %3491 = vsyncadd [#allocation6], 4294950912  ;;  %v3500_v0 = vmov 0.0   ;;  %vm3501_vm0 = vmmov 0   ;;  %v98_v1 = vlaneseq  ;;  %vm349_vm1 = vcmask 124928   ;;  %s3914_s21 = sld [smem:[#allocation15_spill]] }
  0x24   :  { %3148 = vmatprep.subr.mxu1 %v3500_v0  ;;  %3152 = vmatprep.mubr.msk.f32.mxu1 %vm3501_vm0, %v3500_v0  ;;  %v272_v6 = vld [vmem:[%s3890_s5] sm:$0x7]  ;;  %vm432_vm2 = vcmask 125952   ;;  %vm275_vm3 = vcmask 130048   ;;  %v358_v7 = vld [vmem:[%s3891_s6 + $0x8] sm:$0xff]  ;;  %s3915_s30 = sld [smem:[#allocation12_spill]] }
  0x25   :  { %v3624_v2 = vshrl.u32 %v98_v1, 7  ;;  %v350_v8 = vsel %vm349_vm1, %v272_v6, 0.0  ;;  %v357_v9 = vld [vmem:[%s3891_s6] sm:$0xff]  ;;  %s3916_s0 = sld [smem:[#allocation14_spill]]  ;;  %v3502_v29 = vmov 3   ;;  %v3503_v30 = vmov 4  }
  0x26   :  { %v356_v10 = vld [vmem:[%s3892_s7] sm:$0xf]  ;;  %351 = vadd.xlane.f32.xlu0 %v350_v8  ;;  %3199 = vset.pattern.permute.xlu1 %v3503_v30  ;;  %s3917_s1 = sld [smem:[#allocation11_spill]]  ;;  %vm122_vm4 = vcmask 261120   ;;  %vm442_vm5 = vcmask 1041409   ;;  %vm444_vm6 = vcmask 1042434  }
  0x27   :  { %v3627_v3 = vsub.s32 0, %v3624_v2  ;;  %v433_v12 = vsel %vm432_vm2, %v356_v10, 0.0  ;;  %v3653_v14 = vsub.s32 1, %v3624_v2  ;;  %v3671_v19 = vsub.s32 2, %v3624_v2  ;;  %v3681_v28 = vld [vmem:[%s3893_s8] sm:$0xff]  ;;  %3198 = vset.pattern.permute.xlu0 %v3502_v29  ;;  %s3918_s3 = sld [smem:[#allocation13_spill]] }
  0x28   :  { %v199_v21 = vsub.s32 3, %v3624_v2  ;;  %v3689_v39 = vld [vmem:[%s3894_s9] sm:$0xff]  ;;  %vm484_vm7 = vcmask 1042432   ;;  %vm481_vm8 = vcmask 23552   ;;  %vm458_vm9 = vcmask 1043459  }
  0x29   :  { %v274_v4 = vld [vmem:[%s3914_s21 + $0x8] sm:$0xff]  ;;  %v273_v5 = vld [vmem:[%s3914_s21] sm:$0xff]  ;;  %vm574_vm10 = vcmask 1043456   ;;  %vm571_vm11 = vcmask 31744   ;;  %vm659_vm12 = vcmask 523264   ;;  %vm2722_vm13 = vcmask 7168  }
  0x2a   :  { %3149 = vmatpush3.msra.mxu1 %v274_v4  ;;  %v97_v11 = vld [vmem:[%s3915_s30] sm:$0x7]  ;;  %434 = vadd.xlane.f32.xlu0 %v433_v12  ;;  %s3505_s30 = smov 126  }
  0x2b   :  { %3150 = vmatprep.subr.mxu1 %v3500_v0  ;;  %v101_v13 = vrot.slane %v97_v11, %v3627_v3  ;;  %v175_v15 = vld [vmem:[%s3916_s0] sm:$0xf]  ;;  %v108_v16 = vrot.slane %v97_v11, %v3653_v14  ;;  %v115_v23 = vrot.slane %v97_v11, %v3671_v19 }
  0x2c   :  { %3151 = vmatpush3.msra.mxu1 %v273_v5  ;;  %v179_v17 = vrot.slane %v175_v15, %v3627_v3  ;;  %v186_v18 = vrot.slane %v175_v15, %v3653_v14  ;;  %v193_v20 = vrot.slane %v175_v15, %v3671_v19  ;;  %v200_v22 = vrot.slane %v175_v15, %v199_v21  ;;  %v94_v61 = vld [vmem:[%s3917_s1] sm:$0xff]  ;;  %v95_v62 = vld [vmem:[%s3917_s1 + $0x8] sm:$0xff] }
  0x2d   :  { %3153 = vmatmul.mubr.msk.f32.vlgmr.msra.gmra.mxu1 %vm275_vm3, %v272_v6  ;;  %3155 = vmatprep.subr.mxu1 %v3500_v0  ;;  %v171_v6 = vld [vmem:[%s3918_s3] sm:$0xff]  ;;  %v172_v12 = vld [vmem:[%s3918_s3 + $0x8] sm:$0xff] }
  0x2e   :  { %3156 = vmatpush3.msra.mxu1 %v358_v7  ;;  %3159 = vmatprep.mubr.msk.f32.mxu1 %vm3501_vm0, %v3500_v0 }
  0x2f   :  { %3157 = vmatprep.subr.mxu1 %v3500_v0  ;;  %103 = vbcast.lane.b32.xlu1 %v101_v13, 256 }
  0x30   :  { %3158 = vmatpush3.msra.mxu1 %v357_v9 }
  0x31   :  { %3160 = vmatmul.mubr.msk.f32.vlgmr.msra.gmra.mxu1 %vm275_vm3, %v356_v10  ;;  %3162 = vmatprep.subr.mxu1 %v3500_v0  ;;  %vm2807_vm3 = vcmask 16384  }
  0x32   :  { %3164 = vmatprep.mubr.msk.f32.mxu1 %vm3501_vm0, %v3500_v0 }
  0x33   :  { %110 = vbcast.lane.b32.xlu1 %v108_v16, 256 }
  0x37   :  { %181 = vbcast.lane.b32.xlu1 %v179_v17, 256 }
  0x3b   :  { %188 = vbcast.lane.b32.xlu1 %v186_v18, 256 }
  0x3f   :  { %195 = vbcast.lane.b32.xlu1 %v193_v20, 256  ;;  %v96_v20 = vld [vmem:[%s3917_s1 + $0x10] sm:$0xff] }
  0x40   :  { %117 = vbcast.lane.b32.xlu0 %v115_v23, 256 }
  0x43   :  { %202 = vbcast.lane.b32.xlu1 %v200_v22, 256 }
  0x44   :  { %471 = vperm.xlu0 %3198, %v3681_v28  }
  0x48   :  { %3205 = vset.pattern.permute.xlu0 %v3503_v30 }
  0xa1   :  { %v104_v40 = vpop.permute.xlu1 %103 }
  0xa2   :  { %v144_v44 = vrot.slane %v104_v40, 4  ;;  %v119_v9 = vmul.f32 %v104_v40, %v94_v61 }
  0xa4   :  { %v145_v49 = vadd.f32 %v144_v44, %v104_v40 }
  0xa5   :  { %v111_v41 = vpop.permute.xlu1 %110 }
  0xa6   :  { %v150_v45 = vrot.slane %v111_v41, 4  ;;  %v146_v56 = vrot.slane %v145_v49, 2  ;;  %v120_v10 = vmul.f32 %v111_v41, %v95_v62 }
  0xa8   :  { %v151_v51 = vadd.f32 %v150_v45, %v111_v41  ;;  %v147_v5 = vadd.f32 %v146_v56, %v145_v49 }
  0xa9   :  { %v182_v42 = vpop.permute.xlu1 %181 }
  0xaa   :  { %v236_v47 = vrot.slane %v182_v42, 4  ;;  %v152_v58 = vrot.slane %v151_v51, 2  ;;  %v204_v15 = vmul.f32 %v182_v42, %v171_v6  ;;  %v148_v18 = vrot.slane %v147_v5, 1 }
  0xac   :  { %v237_v53 = vadd.f32 %v236_v47, %v182_v42  ;;  %v153_v8 = vadd.f32 %v152_v58, %v151_v51 }
  0xad   :  { %v189_v43 = vpop.permute.xlu1 %188 }
  0xae   :  { %v242_v50 = vrot.slane %v189_v43, 4  ;;  %v238_v63 = vrot.slane %v237_v53, 2  ;;  %v154_v23 = vrot.slane %v153_v8, 1 }
  0xaf   :  { %v352_v24 = vpop.xlane.xlu0 %351 }
  0xb0   :  { %v353_v25 = vmax.f32 %v352_v24, 1e-09  ;;  %v243_v57 = vadd.f32 %v242_v50, %v189_v43  ;;  %v239_v16 = vadd.f32 %v238_v63, %v237_v53  ;;  %v205_v24 = vmul.f32 %v189_v43, %v172_v12 }
  0xb1   :  { %v196_v46 = vpop.permute.xlu1 %195  ;;  %v155_v41 = vadd.f32 %v154_v23, %v153_v8 }
  0xb2   :  { %3398 = vrcp.f32 %v353_v25  ;;  %v248_v54 = vrot.slane %v196_v46, 4  ;;  %v244_v7 = vrot.slane %v243_v57, 2  ;;  %v173_v25 = vld [vmem:[%s3918_s3 + $0x10] sm:$0xff]  ;;  %v215_v42 = vsel %vm122_vm4, %v205_v24, 0.0 }
  0xb3   :  { %v435_v26 = vpop.xlane.xlu0 %434  ;;  %v216_v53 = vrot.slane %v215_v42, 4 }
  0xb4   :  { %v436_v27 = vmax.f32 %v435_v26, 1e-09  ;;  %v249_v4 = vadd.f32 %v248_v54, %v196_v46  ;;  %v245_v22 = vadd.f32 %v244_v7, %v243_v57  ;;  %v123_v26 = vsel %vm122_vm4, %v119_v9, 0.0 }
  0xb5   :  { %v203_v55 = vpop.permute.xlu1 %202  ;;  %v124_v40 = vrot.slane %v123_v26, 4  ;;  %v163_v57 = vmax.f32 %v155_v41, 1e-09  ;;  %v217_v7 = vadd.f32 %v216_v53, %v215_v42 }
  0xb6   :  { %3400 = vrcp.f32 %v436_v27  ;;  %v254_v60 = vrot.slane %v203_v55, 4  ;;  %v250_v17 = vrot.slane %v249_v4, 2  ;;  %v130_v27 = vsel %vm122_vm4, %v120_v10, 0.0 }
  0xb7   :  { %v118_v48 = vpop.permute.xlu0 %117  ;;  %v131_v43 = vrot.slane %v130_v27, 4  ;;  %v125_v56 = vadd.f32 %v124_v40, %v123_v26 }
  0xb8   :  { %v156_v52 = vrot.slane %v118_v48, 4  ;;  %v255_v13 = vadd.f32 %v254_v60, %v203_v55 }
  0xb9   :  { %v132_v58 = vadd.f32 %v131_v43, %v130_v27  ;;  %v126_v8 = vrot.slane %v125_v56, 2 }
  0xba   :  { %v157_v59 = vadd.f32 %v156_v52, %v118_v48  ;;  %v256_v30 = vrot.slane %v255_v13, 2 }
  0xbb   :  { %v127_v24 = vadd.f32 %v126_v8, %v125_v56 }
  0xbc   :  { %v158_v11 = vrot.slane %v157_v59, 2  ;;  %v257_v47 = vadd.f32 %v256_v30, %v255_v13  ;;  %v133_v13 = vrot.slane %v132_v58, 2 }
  0xbe   :  { %v159_v29 = vadd.f32 %v158_v11, %v157_v59  ;;  %v258_v61 = vrot.slane %v257_v47, 1 }
  0xbf   :  { %v3399_v31 = vpop.eup %3398 }
  0xc0   :  { %v160_v45 = vrot.slane %v159_v29, 1  ;;  %v259_v12 = vadd.f32 %v258_v61, %v257_v47 }
  0xc2   :  { %v161_v60 = vadd.f32 %v160_v45, %v159_v29  ;;  %v263_v23 = vmax.f32 %v259_v12, 1e-09  ;;  %v720_v12 = vld [vmem:[#allocation2 + $0x1c0] sm:$0xff] }
  0xc3   :  { %v3401_v34 = vpop.eup %3400 }
  0xc4   :  { %v164_v10 = vmax.f32 %v161_v60, 1e-09 }
  0xed   :  { %v345_v32 = vpop.f32.mrf.mxu1 }
  0xee   :  { %v355_v33 = vmul.f32 %v3399_v31, %v345_v32  ;;  %v208_v31 = vsel %vm122_vm4, %v204_v15, 0.0  ;;  %v240_v32 = vrot.slane %v239_v16, 1 }
  0xef   :  { %v3154_v35 = vpop.f32.mrf.mxu1  ;;  %v209_v44 = vrot.slane %v208_v31, 4 }
  0xf0   :  { %448 = vrot.lane.b32.xlu1 %v355_v33, %s3496_s2  ;;  %v121_v33 = vmul.f32 %v118_v48, %v96_v20  ;;  %v149_v35 = vadd.f32 %v148_v18, %v147_v5  ;;  %v241_v49 = vadd.f32 %v240_v32, %v239_v16  ;;  %v218_v18 = vrot.slane %v217_v7, 2 }
  0xf1   :  { %v428_v36 = vpop.f32.mrf.mxu1  ;;  %v210_v6 = vadd.f32 %v209_v44, %v208_v31  ;;  %v128_v32 = vrot.slane %v127_v24, 1 }
  0xf2   :  { %v438_v37 = vmul.f32 %v3401_v34, %v428_v36  ;;  %v251_v34 = vadd.f32 %v250_v17, %v249_v4  ;;  %v246_v36 = vrot.slane %v245_v22, 1  ;;  %v137_v50 = vsel %vm122_vm4, %v121_v33, 0.0 }
  0xf3   :  { %v3161_v38 = vpop.f32.mrf.mxu1  ;;  %v162_v52 = vmax.f32 %v149_v35, 1e-09  ;;  %v138_v59 = vrot.slane %v137_v50, 4  ;;  %v260_v62 = vmax.f32 %v241_v49, 1e-09  ;;  %v211_v17 = vrot.slane %v210_v6, 2 }
  0xf4   :  { %462 = vrot.lane.b32.xlu1 %v438_v37, %s3496_s2  ;;  %v206_v37 = vmul.f32 %v196_v46, %v173_v25  ;;  %v174_v38 = vld [vmem:[%s3918_s3 + $0x18] sm:$0xff]  ;;  %v252_v48 = vrot.slane %v251_v34, 1  ;;  %v247_v46 = vadd.f32 %v246_v36, %v245_v22  ;;  %v134_v25 = vadd.f32 %v133_v13, %v132_v58  ;;  %v724_v13 = vld [vmem:[#allocation2 + $0x1e0] sm:$0xff] }
  0xf5   :  { %v207_v51 = vmul.f32 %v203_v55, %v174_v38  ;;  %3402 = vrcp.f32 %v162_v52  ;;  %v139_v9 = vadd.f32 %v138_v59, %v137_v50  ;;  %v212_v27 = vadd.f32 %v211_v17, %v210_v6  ;;  %v725_v17 = vld [vmem:[#allocation2 + $0x1e8] sm:$0xff] }
  0xf6   :  { %v222_v54 = vsel %vm122_vm4, %v206_v37, 0.0  ;;  %v253_v4 = vadd.f32 %v252_v48, %v251_v34  ;;  %v261_v55 = vmax.f32 %v247_v46, 1e-09  ;;  %3404 = vrcp.f32 %v163_v57 }
  0xf7   :  { %v223_v63 = vrot.slane %v222_v54, 4  ;;  %v229_v5 = vsel %vm122_vm4, %v207_v51, 0.0  ;;  %3406 = vrcp.f32 %v260_v62  ;;  %v140_v20 = vrot.slane %v139_v9, 2 }
  0xf8   :  { %561 = vperm.xlu1 %3199, %v3689_v39   ;;  %v230_v11 = vrot.slane %v229_v5, 4  ;;  %v262_v16 = vmax.f32 %v253_v4, 1e-09  ;;  %3408 = vrcp.f32 %v261_v55  ;;  %v219_v29 = vadd.f32 %v218_v18, %v217_v7  ;;  %v712_v18 = vld [vmem:[#allocation2 + $0x180] sm:$0xff] }
  0xf9   :  { %v224_v15 = vadd.f32 %v223_v63, %v222_v54  ;;  %3410 = vrcp.f32 %v164_v10  ;;  %v141_v30 = vadd.f32 %v140_v20, %v139_v9  ;;  %v135_v33 = vrot.slane %v134_v25, 1  ;;  %v716_v20 = vld [vmem:[#allocation2 + $0x1a0] sm:$0xff] }
  0xfa   :  { %v231_v22 = vadd.f32 %v230_v11, %v229_v5  ;;  %3412 = vrcp.f32 %v262_v16  ;;  %v213_v35 = vrot.slane %v212_v27, 1  ;;  %v220_v36 = vrot.slane %v219_v29, 1 }
  0xfb   :  { %v225_v26 = vrot.slane %v224_v15, 2  ;;  %3414 = vrcp.f32 %v263_v23  ;;  %v142_v40 = vrot.slane %v141_v30, 1  ;;  %v129_v42 = vadd.f32 %v128_v32, %v127_v24 }
  0xfc   :  { %v232_v31 = vrot.slane %v231_v22, 2  ;;  %v136_v43 = vadd.f32 %v135_v33, %v134_v25  ;;  %v214_v47 = vadd.f32 %v213_v35, %v212_v27  ;;  %v221_v49 = vadd.f32 %v220_v36, %v219_v29  ;;  %v713_v25 = vld [vmem:[#allocation2 + $0x188] sm:$0xff]  ;;  %v708_v29 = vld [vmem:[#allocation2 + $0x160] sm:$0xff] }
  0xfd   :  { %v226_v34 = vadd.f32 %v225_v26, %v224_v15  ;;  %v143_v51 = vadd.f32 %v142_v40, %v141_v30  ;;  %v721_v15 = vld [vmem:[#allocation2 + $0x1c8] sm:$0xff]  ;;  %v2903_v16 = vcombine.high %v720_v12, %v724_v13  ;;  %v2895_v24 = vcombine.high %v712_v18, %v716_v20  ;;  %v696_v35 = vld [vmem:[#allocation2 + $0x100] sm:$0xff] }
  0xfe   :  { %v233_v41 = vadd.f32 %v232_v31, %v231_v22  ;;  %v2904_v22 = vcombine.low %v721_v15, %v725_v17  ;;  %v2905_v23 = vcombine.high %v721_v15, %v725_v17  ;;  %v717_v26 = vld [vmem:[#allocation2 + $0x1a8] sm:$0xff]  ;;  %v700_v36 = vld [vmem:[#allocation2 + $0x120] sm:$0xff] }
  0xff   :  { %v227_v44 = vrot.slane %v226_v34, 1  ;;  %1474 = vmatprep.subr.bf16.mxu0 %v2903_v16  ;;  %v2897_v27 = vcombine.high %v713_v25, %v717_v26  ;;  %v705_v30 = vld [vmem:[#allocation2 + $0x148] sm:$0xff]  ;;  %v2896_v32 = vcombine.low %v713_v25, %v717_v26  ;;  %v784_v17 = vld [vmem:[#allocation2 + $0x3c0] sm:$0xff] }
 0x100   :  { %v234_v48 = vrot.slane %v233_v41, 1  ;;  %v709_v31 = vld [vmem:[#allocation2 + $0x168] sm:$0xff]  ;;  %v776_v26 = vld [vmem:[#allocation2 + $0x380] sm:$0xff] }
 0x101   :  { %v228_v53 = vadd.f32 %v227_v44, %v226_v34  ;;  %v2889_v34 = vcombine.high %v705_v30, %v709_v31  ;;  %v688_v44 = vld [vmem:[#allocation2 + $0xc0] sm:$0xff] }
 0x102   :  { %v3403_v37 = vpop.eup %3402  ;;  %v235_v60 = vadd.f32 %v234_v48, %v233_v41  ;;  %v2888_v41 = vcombine.low %v705_v30, %v709_v31 }
 0x103   :  { %v3405_v38 = vpop.eup %3404  ;;  %v168_v46 = vmul.f32 %v3403_v37, %v129_v42  ;;  %v697_v37 = vld [vmem:[#allocation2 + $0x108] sm:$0xff]  ;;  %v2879_v42 = vcombine.high %v696_v35, %v700_v36 }
 0x104   :  { %v3407_v45 = vpop.eup %3406  ;;  %v169_v54 = vmul.f32 %v3405_v38, %v136_v43  ;;  %v701_v38 = vld [vmem:[#allocation2 + $0x128] sm:$0xff] }
 0x105   :  { %v3409_v50 = vpop.eup %3408  ;;  %v268_v57 = vmul.f32 %v3407_v45, %v214_v47  ;;  %v2881_v43 = vcombine.high %v697_v37, %v701_v38  ;;  %v692_v45 = vld [vmem:[#allocation2 + $0xe0] sm:$0xff]  ;;  %v689_v47 = vld [vmem:[#allocation2 + $0xc8] sm:$0xff]  ;;  %v2880_v48 = vcombine.low %v697_v37, %v701_v38 }
 0x106   :  { %v3411_v52 = vpop.eup %3410  ;;  %v269_v58 = vmul.f32 %v3409_v50, %v221_v49  ;;  %v443_v62 = vsel %vm442_vm5, %v169_v54, %v168_v46  ;;  %v693_v49 = vld [vmem:[#allocation2 + $0xe8] sm:$0xff]  ;;  %v2878_v50 = vcombine.low %v696_v35, %v700_v36  ;;  %v684_v46 = vld [vmem:[#allocation2 + $0xa0] sm:$0xff] }
 0x107   :  { %v3413_v56 = vpop.eup %3412  ;;  %v170_v59 = vmul.f32 %v3411_v52, %v143_v51  ;;  %v2871_v51 = vcombine.high %v688_v44, %v692_v45  ;;  %v2873_v52 = vcombine.high %v689_v47, %v693_v49  ;;  %v681_v54 = vld [vmem:[#allocation2 + $0x88] sm:$0xff] }
 0x108   :  { %v3415_v61 = vpop.eup %3414  ;;  %v270_v63 = vmul.f32 %v3413_v56, %v228_v53  ;;  %v456_v4 = vsel %vm442_vm5, %v269_v58, %v268_v57  ;;  %v680_v53 = vld [vmem:[#allocation2 + $0x80] sm:$0xff]  ;;  %v685_v56 = vld [vmem:[#allocation2 + $0xa8] sm:$0xff]  ;;  %v2870_v57 = vcombine.low %v688_v44, %v692_v45  ;;  %v2872_v58 = vcombine.low %v689_v47, %v693_v49 }
 0x109   :  { %v445_v6 = vsel %vm444_vm6, %v170_v59, %v443_v62  ;;  %v271_v7 = vmul.f32 %v3415_v61, %v235_v60  ;;  %v2863_v59 = vcombine.high %v680_v53, %v684_v46  ;;  %v2865_v60 = vcombine.high %v681_v54, %v685_v56  ;;  %v672_v61 = vld [vmem:[#allocation2 + $0x40] sm:$0xff]  ;;  %v769_v35 = vld [vmem:[#allocation2 + $0x348] sm:$0xff] }
 0x10a   :  { %v457_v8 = vsel %vm444_vm6, %v270_v63, %v456_v4  ;;  %v676_v62 = vld [vmem:[#allocation2 + $0x60] sm:$0xff]  ;;  %v673_v63 = vld [vmem:[#allocation2 + $0x48] sm:$0xff] }
 0x10b   :  { %v459_v9 = vsel %vm458_vm9, %v271_v7, %v457_v8  ;;  %v677_v4 = vld [vmem:[#allocation2 + $0x68] sm:$0xff]  ;;  %v2855_v7 = vcombine.high %v672_v61, %v676_v62  ;;  %v664_v8 = vld [vmem:[#allocation2] sm:$0xff] }
 0x10c   :  { %v773_v36 = vld [vmem:[#allocation2 + $0x368] sm:$0xff] }
 0x10d   :  { %v761_v44 = vld [vmem:[#allocation2 + $0x308] sm:$0xff]  ;;  %v2952_v49 = vcombine.low %v769_v35, %v773_v36 }
 0x10e   :  { %v765_v45 = vld [vmem:[#allocation2 + $0x328] sm:$0xff] }
 0x162   :  { %v449_v5 = vpop.permute.xlu1 %448 }
 0x163   :  { %v451_v55 = vsel %vm122_vm4, %v445_v6, %v449_v5  ;;  %v2862_v5 = vcombine.low %v680_v53, %v684_v46  ;;  %v2864_v6 = vcombine.low %v681_v54, %v685_v56  ;;  %v753_v53 = vld [vmem:[#allocation2 + $0x2c8] sm:$0xff]  ;;  %v2944_v56 = vcombine.low %v761_v44, %v765_v45 }
 0x164   :  { %3163 = vmatpush3.msk.msra.mxu1 %vm484_vm7, %v451_v55  ;;  %v2857_v55 = vcombine.high %v673_v63, %v677_v4  ;;  %v757_v46 = vld [vmem:[#allocation2 + $0x2e8] sm:$0xff] }
 0x165   :  { %3165 = vmatmul.mubr.msk.f32.vlgmr.msra.gmra.mxu1 %vm481_vm8, %v3681_v28  ;;  %3167 = vmatprep.subr.mxu1 %v3500_v0  ;;  %v2902_v28 = vcombine.low %v720_v12, %v724_v13  ;;  %v2854_v12 = vcombine.low %v672_v61, %v676_v62  ;;  %v2856_v13 = vcombine.low %v673_v63, %v677_v4  ;;  %v745_v61 = vld [vmem:[#allocation2 + $0x288] sm:$0xff] }
 0x166   :  { %v463_v10 = vpop.permute.xlu1 %462  ;;  %3169 = vmatprep.mubr.msk.f32.mxu1 %vm3501_vm0, %v3500_v0  ;;  %v704_v0 = vld [vmem:[#allocation2 + $0x140] sm:$0xff]  ;;  %v749_v62 = vld [vmem:[#allocation2 + $0x2a8] sm:$0xff]  ;;  %v2936_v4 = vcombine.low %v753_v53, %v757_v46 }
 0x167   :  { %v465_v11 = vsel %vm122_vm4, %v459_v9, %v463_v10  ;;  %1475 = vmatpush1.bf16.msra.mxu0 %v2902_v28  ;;  %v2887_v33 = vcombine.high %v704_v0, %v708_v29  ;;  %v2886_v40 = vcombine.low %v704_v0, %v708_v29  ;;  %v668_v9 = vld [vmem:[#allocation2 + $0x20] sm:$0xff]  ;;  %v665_v10 = vld [vmem:[#allocation2 + $0x8] sm:$0xff] }
 0x168   :  { %3168 = vmatpush3.msk.msra.mxu1 %vm574_vm10, %v465_v11  ;;  %1476 = vmatprep.subr.bf16.mxu0 %v2895_v24  ;;  %v669_v11 = vld [vmem:[#allocation2 + $0x28] sm:$0xff]  ;;  %v2847_v15 = vcombine.high %v664_v8, %v668_v9  ;;  %v788_v28 = vld [vmem:[#allocation2 + $0x3e0] sm:$0xff] }
 0x169   :  { %3170 = vmatmul.mubr.msk.f32.vlgmr.msra.gmra.mxu1 %vm571_vm11, %v3689_v39  ;;  %1515 = vmatprep.subr.bf16.mxu1 %v2905_v23  ;;  %v2894_v39 = vcombine.low %v712_v18, %v716_v20  ;;  %v2849_v16 = vcombine.high %v665_v10, %v669_v11  ;;  %v785_v18 = vld [vmem:[#allocation2 + $0x3c8] sm:$0xff]  ;;  %v2848_v23 = vcombine.low %v665_v10, %v669_v11  ;;  %v780_v0 = vld [vmem:[#allocation2 + $0x3a0] sm:$0xff] }
 0x16a   :  { %1516 = vmatpush1.bf16.msra.mxu1 %v2904_v22  ;;  %v789_v20 = vld [vmem:[#allocation2 + $0x3e8] sm:$0xff]  ;;  %v2846_v22 = vcombine.low %v664_v8, %v668_v9  ;;  %v2967_v24 = vcombine.high %v784_v17, %v788_v28  ;;  %v2966_v30 = vcombine.low %v784_v17, %v788_v28  ;;  %v2958_v37 = vcombine.low %v776_v26, %v780_v0  ;;  %v728_v17 = vld [vmem:[#allocation2 + $0x200] sm:$0xff] }
 0x16b   :  { %1517 = vmatprep.subr.bf16.mxu1 %v2897_v27  ;;  %1477 = vmatpush1.bf16.msra.mxu0 %v2894_v39  ;;  %v2969_v25 = vcombine.high %v785_v18, %v789_v20  ;;  %v777_v27 = vld [vmem:[#allocation2 + $0x388] sm:$0xff]  ;;  %v2968_v31 = vcombine.low %v785_v18, %v789_v20  ;;  %v2959_v39 = vcombine.high %v776_v26, %v780_v0  ;;  %v732_v28 = vld [vmem:[#allocation2 + $0x220] sm:$0xff] }
 0x16c   :  { %1478 = vmatprep.subr.bf16.mxu0 %v2887_v33  ;;  %v781_v29 = vld [vmem:[#allocation2 + $0x3a8] sm:$0xff]  ;;  %v768_v33 = vld [vmem:[#allocation2 + $0x340] sm:$0xff]  ;;  %v2928_v11 = vcombine.low %v745_v61, %v749_v62  ;;  %v2911_v20 = vcombine.high %v728_v17, %v732_v28 }
 0x16d   :  { %v2960_v38 = vcombine.low %v777_v27, %v781_v29  ;;  %v737_v8 = vld [vmem:[#allocation2 + $0x248] sm:$0xff] }
 0x16e   :  { %1518 = vmatpush1.bf16.msra.mxu1 %v2896_v32  ;;  %v2961_v32 = vcombine.high %v777_v27, %v781_v29  ;;  %v741_v9 = vld [vmem:[#allocation2 + $0x268] sm:$0xff]  ;;  %v2910_v29 = vcombine.low %v728_v17, %v732_v28 }
 0x16f   :  { %1519 = vmatprep.subr.bf16.mxu1 %v2889_v34  ;;  %1479 = vmatpush1.bf16.msra.mxu0 %v2886_v40  ;;  %v772_v34 = vld [vmem:[#allocation2 + $0x360] sm:$0xff]  ;;  %v729_v18 = vld [vmem:[#allocation2 + $0x208] sm:$0xff] }
 0x170   :  { %1480 = vmatprep.subr.bf16.mxu0 %v2879_v42  ;;  %v2951_v40 = vcombine.high %v768_v33, %v772_v34  ;;  %v760_v42 = vld [vmem:[#allocation2 + $0x300] sm:$0xff]  ;;  %v2950_v47 = vcombine.low %v768_v33, %v772_v34 }
 0x172   :  { %1520 = vmatpush1.bf16.msra.mxu1 %v2888_v41  ;;  %v2953_v41 = vcombine.high %v769_v35, %v773_v36  ;;  %v727_v36 = vld [vmem:[#allocation2 + $0x1f8] sm:$0xff] }
 0x173   :  { %1521 = vmatprep.subr.bf16.mxu1 %v2881_v43  ;;  %1481 = vmatpush1.bf16.msra.mxu0 %v2878_v50  ;;  %v764_v43 = vld [vmem:[#allocation2 + $0x320] sm:$0xff]  ;;  %v562_v26 = vpop.permute.xlu1 %561 }
 0x174   :  { %1482 = vmatprep.subr.bf16.mxu0 %v2871_v51  ;;  %v2943_v50 = vcombine.high %v760_v42, %v764_v43  ;;  %v752_v51 = vld [vmem:[#allocation2 + $0x2c0] sm:$0xff]  ;;  %v2942_v54 = vcombine.low %v760_v42, %v764_v43 }
 0x176   :  { %1522 = vmatpush1.bf16.msra.mxu1 %v2880_v48  ;;  %v2945_v48 = vcombine.high %v761_v44, %v765_v45 }
 0x177   :  { %1523 = vmatprep.subr.bf16.mxu1 %v2873_v52  ;;  %1483 = vmatpush1.bf16.msra.mxu0 %v2870_v57  ;;  %v756_v52 = vld [vmem:[#allocation2 + $0x2e0] sm:$0xff] }
 0x178   :  { %1484 = vmatprep.subr.bf16.mxu0 %v2863_v59  ;;  %v2935_v57 = vcombine.high %v752_v51, %v756_v52  ;;  %v744_v59 = vld [vmem:[#allocation2 + $0x280] sm:$0xff]  ;;  %v2934_v63 = vcombine.low %v752_v51, %v756_v52 }
 0x17a   :  { %1524 = vmatpush1.bf16.msra.mxu1 %v2872_v58  ;;  %v2937_v58 = vcombine.high %v753_v53, %v757_v46  ;;  %v714_v46 = vld [vmem:[#allocation2 + $0x190] sm:$0xff] }
 0x17b   :  { %1525 = vmatprep.subr.bf16.mxu1 %v2865_v60  ;;  %1485 = vmatpush1.bf16.msra.mxu0 %v2862_v5  ;;  %v748_v60 = vld [vmem:[#allocation2 + $0x2a0] sm:$0xff] }
 0x17c   :  { %1486 = vmatprep.subr.bf16.mxu0 %v2855_v7  ;;  %v2927_v5 = vcombine.high %v744_v59, %v748_v60  ;;  %v736_v7 = vld [vmem:[#allocation2 + $0x240] sm:$0xff]  ;;  %v2926_v10 = vcombine.low %v744_v59, %v748_v60  ;;  %v719_v59 = vld [vmem:[#allocation2 + $0x1b8] sm:$0xff] }
 0x17e   :  { %1526 = vmatpush1.bf16.msra.mxu1 %v2864_v6  ;;  %v2929_v6 = vcombine.high %v745_v61, %v749_v62  ;;  %v706_v62 = vld [vmem:[#allocation2 + $0x150] sm:$0xff] }
 0x17f   :  { %1527 = vmatprep.subr.bf16.mxu1 %v2857_v55  ;;  %1487 = vmatpush1.bf16.msra.mxu0 %v2854_v12  ;;  %v740_v55 = vld [vmem:[#allocation2 + $0x260] sm:$0xff] }
 0x180   :  { %1488 = vmatprep.subr.bf16.mxu0 %v2847_v15  ;;  %v2919_v12 = vcombine.high %v736_v7, %v740_v55  ;;  %v2918_v15 = vcombine.low %v736_v7, %v740_v55  ;;  %v711_v7 = vld [vmem:[#allocation2 + $0x178] sm:$0xff] }
 0x182   :  { %1528 = vmatpush1.bf16.msra.mxu1 %v2856_v13  ;;  %v2921_v13 = vcombine.high %v737_v8, %v741_v9 }
 0x183   :  { %1529 = vmatprep.subr.bf16.mxu1 %v2849_v16  ;;  %1489 = vmatpush1.bf16.msra.mxu0 %v2846_v22  ;;  %v2920_v16 = vcombine.low %v737_v8, %v741_v9  ;;  %v733_v22 = vld [vmem:[#allocation2 + $0x228] sm:$0xff] }
 0x184   :  { %1490 = vmatprep.subr.bf16.mxu0 %v2967_v24  ;;  %v472_v24 = vpop.permute.xlu0 %471  ;;  %v2912_v0 = vcombine.low %v729_v18, %v733_v22  ;;  %v2913_v27 = vcombine.high %v729_v18, %v733_v22  ;;  %v694_v22 = vld [vmem:[#allocation2 + $0xf0] sm:$0xff] }
 0x186   :  { %1530 = vmatpush1.bf16.msra.mxu1 %v2848_v23  ;;  %v2840_v23 = vld [vmem:[%s3895_s10] ss:$0 sm:$0xff]  ;;  %s3504_s10 = smov 64  }
 0x187   :  { %1531 = vmatprep.subr.bf16.mxu1 %v2969_v25  ;;  %1491 = vmatpush2.bf16.msra.mxu0 %v2966_v30  ;;  %v2843_v25 = vld [vmem:[%s3896_s11] ss:$0 sm:$0xff]  ;;  %v480_v33 = vmul.f32 %v2840_v23, %v472_v24  ;;  %v691_v23 = vld [vmem:[#allocation2 + $0xd8] sm:$0xff] }
 0x188   :  { %1492 = vmatprep.subr.bf16.mxu0 %v2959_v39  ;;  %v726_v39 = vld [vmem:[#allocation2 + $0x1f0] sm:$0xff]  ;;  %v570_v34 = vmul.f32 %v2843_v25, %v562_v26  ;;  %v695_v24 = vld [vmem:[#allocation2 + $0xf8] sm:$0xff] }
 0x18a   :  { %1532 = vmatpush2.bf16.msra.mxu1 %v2968_v31  ;;  %v722_v31 = vld [vmem:[#allocation2 + $0x1d0] sm:$0xff] }
 0x18b   :  { %1533 = vmatprep.subr.bf16.mxu1 %v2961_v32  ;;  %1493 = vmatpush2.bf16.msra.mxu0 %v2958_v37  ;;  %v723_v32 = vld [vmem:[#allocation2 + $0x1d8] sm:$0xff]  ;;  %v2907_v35 = vcombine.high %v722_v31, %v726_v39 }
 0x18c   :  { %1494 = vmatprep.subr.bf16.mxu0 %v2951_v40  ;;  %v2908_v40 = vcombine.low %v723_v32, %v727_v36 }
 0x18e   :  { %1534 = vmatpush2.bf16.msra.mxu1 %v2960_v38  ;;  %v2906_v38 = vcombine.low %v722_v31, %v726_v39  ;;  %v683_v31 = vld [vmem:[#allocation2 + $0x98] sm:$0xff] }
 0x18f   :  { %1535 = vmatprep.subr.bf16.mxu1 %v2953_v41  ;;  %1495 = vmatpush2.bf16.msra.mxu0 %v2950_v47  ;;  %v2909_v41 = vcombine.high %v723_v32, %v727_v36  ;;  %v687_v39 = vld [vmem:[#allocation2 + $0xb8] sm:$0xff]  ;;  %v674_v36 = vld [vmem:[#allocation2 + $0x50] sm:$0xff] }
 0x190   :  { %1496 = vmatprep.subr.bf16.mxu0 %v2943_v50 }
 0x192   :  { %1536 = vmatpush2.bf16.msra.mxu1 %v2952_v49 }
 0x193   :  { %1537 = vmatprep.subr.bf16.mxu1 %v2945_v48  ;;  %1497 = vmatpush2.bf16.msra.mxu0 %v2942_v54 }
 0x194   :  { %1498 = vmatprep.subr.bf16.mxu0 %v2935_v57  ;;  %v718_v57 = vld [vmem:[#allocation2 + $0x1b0] sm:$0xff] }
 0x195   :  { %v2898_v55 = vcombine.low %v714_v46, %v718_v57 }
 0x196   :  { %1538 = vmatpush2.bf16.msra.mxu1 %v2944_v56 }
 0x197   :  { %1539 = vmatprep.subr.bf16.mxu1 %v2937_v58  ;;  %1499 = vmatpush2.bf16.msra.mxu0 %v2934_v63  ;;  %v715_v58 = vld [vmem:[#allocation2 + $0x198] sm:$0xff]  ;;  %v2899_v63 = vcombine.high %v714_v46, %v718_v57  ;;  %v786_v46 = vld [vmem:[#allocation2 + $0x3d0] sm:$0xff] }
 0x198   :  { %1500 = vmatprep.subr.bf16.mxu0 %v2927_v5  ;;  %v710_v5 = vld [vmem:[#allocation2 + $0x170] sm:$0xff]  ;;  %v2900_v8 = vcombine.low %v715_v58, %v719_v59  ;;  %v791_v57 = vld [vmem:[#allocation2 + $0x3f8] sm:$0xff] }
 0x199   :  { %v2891_v9 = vcombine.high %v706_v62, %v710_v5 }
 0x19a   :  { %1540 = vmatpush2.bf16.msra.mxu1 %v2936_v4  ;;  %v2901_v4 = vcombine.high %v715_v58, %v719_v59 }
 0x19b   :  { %1541 = vmatprep.subr.bf16.mxu1 %v2929_v6  ;;  %1501 = vmatpush2.bf16.msra.mxu0 %v2926_v10  ;;  %v707_v6 = vld [vmem:[#allocation2 + $0x158] sm:$0xff] }
 0x19c   :  { %1502 = vmatprep.subr.bf16.mxu0 %v2919_v12  ;;  %v2893_v10 = vcombine.high %v707_v6, %v711_v7  ;;  %v702_v12 = vld [vmem:[#allocation2 + $0x130] sm:$0xff]  ;;  %v2892_v17 = vcombine.low %v707_v6, %v711_v7  ;;  %v783_v6 = vld [vmem:[#allocation2 + $0x3b8] sm:$0xff] }
 0x19e   :  { %1542 = vmatpush2.bf16.msra.mxu1 %v2928_v11  ;;  %v698_v11 = vld [vmem:[#allocation2 + $0x110] sm:$0xff] }
 0x19f   :  { %1543 = vmatprep.subr.bf16.mxu1 %v2921_v13  ;;  %1503 = vmatpush2.bf16.msra.mxu0 %v2918_v15  ;;  %v699_v13 = vld [vmem:[#allocation2 + $0x118] sm:$0xff]  ;;  %v2883_v28 = vcombine.high %v698_v11, %v702_v12  ;;  %v2882_v25 = vcombine.low %v698_v11, %v702_v12  ;;  %v774_v11 = vld [vmem:[#allocation2 + $0x370] sm:$0xff] }
 0x1a0   :  { %1504 = vmatprep.subr.bf16.mxu0 %v2911_v20  ;;  %v703_v15 = vld [vmem:[#allocation2 + $0x138] sm:$0xff]  ;;  %v690_v20 = vld [vmem:[#allocation2 + $0xd0] sm:$0xff] }
 0x1a1   :  { %v2885_v18 = vcombine.high %v699_v13, %v703_v15  ;;  %v2884_v26 = vcombine.low %v699_v13, %v703_v15  ;;  %v2874_v32 = vcombine.low %v690_v20, %v694_v22  ;;  %v771_v12 = vld [vmem:[#allocation2 + $0x358] sm:$0xff] }
 0x1a2   :  { %1544 = vmatpush2.bf16.msra.mxu1 %v2920_v16  ;;  %v2890_v16 = vcombine.low %v706_v62, %v710_v5  ;;  %v779_v5 = vld [vmem:[#allocation2 + $0x398] sm:$0xff] }
 0x1a3   :  { %1545 = vmatprep.subr.bf16.mxu1 %v2913_v27  ;;  %1505 = vmatpush2.bf16.msra.mxu0 %v2910_v29  ;;  %v2877_v27 = vcombine.high %v691_v23, %v695_v24  ;;  %v682_v29 = vld [vmem:[#allocation2 + $0x90] sm:$0xff]  ;;  %v775_v13 = vld [vmem:[#allocation2 + $0x378] sm:$0xff] }
 0x1a4   :  { %1556 = vmatprep.subr.bf16.mxu0 %v2907_v35  ;;  %v2869_v35 = vcombine.high %v683_v31, %v687_v39 }
 0x1a6   :  { %1546 = vmatpush2.bf16.msra.mxu1 %v2912_v0  ;;  %v2875_v0 = vcombine.high %v690_v20, %v694_v22  ;;  %v766_v20 = vld [vmem:[#allocation2 + $0x330] sm:$0xff]  ;;  %v763_v22 = vld [vmem:[#allocation2 + $0x318] sm:$0xff] }
 0x1a7   :  { %1597 = vmatprep.subr.bf16.mxu1 %v2909_v41 }
 0x225   :  { %v554_v30 = vpop.f32.mrf.mxu1 }
 0x226   :  { %v555_v43 = vadd.f32 %v554_v30, %v480_v33  ;;  %v686_v30 = vld [vmem:[#allocation2 + $0xb0] sm:$0xff]  ;;  %v2876_v33 = vcombine.low %v691_v23, %v695_v24  ;;  %v767_v23 = vld [vmem:[#allocation2 + $0x338] sm:$0xff] }
 0x227   :  { %v3166_v37 = vpop.f32.mrf.mxu1  ;;  %v2866_v41 = vcombine.low %v682_v29, %v686_v30 }
 0x228   :  { %v678_v37 = vld [vmem:[#allocation2 + $0x70] sm:$0xff] }
 0x229   :  { %v644_v42 = vpop.f32.mrf.mxu1 }
 0x22a   :  { %v645_v44 = vadd.f32 %v644_v42, %v570_v34  ;;  %v2867_v34 = vcombine.high %v682_v29, %v686_v30  ;;  %v2868_v42 = vcombine.low %v683_v31, %v687_v39  ;;  %v758_v29 = vld [vmem:[#allocation2 + $0x2f0] sm:$0xff]  ;;  %v755_v30 = vld [vmem:[#allocation2 + $0x2d8] sm:$0xff] }
 0x22b   :  { %v3171_v45 = vpop.f32.mrf.mxu1  ;;  %v759_v31 = vld [vmem:[#allocation2 + $0x2f8] sm:$0xff] }
 0x22c   :  { %v650_v47 = vmul.f32 %v645_v44, %v555_v43  ;;  %v648_v50 = vsub.f32 %v555_v43, %v645_v44  ;;  %v666_v45 = vld [vmem:[#allocation2 + $0x10] sm:$0xff] }
 0x22e   :  { %v3200_v49 = vpack.i.bf16 %v645_v44, %v650_v47  ;;  %v649_v51 = vand.u32 2147483647, %v648_v50  ;;  %v670_v47 = vld [vmem:[#allocation2 + $0x30] sm:$0xff]  ;;  %v671_v50 = vld [vmem:[#allocation2 + $0x38] sm:$0xff] }
 0x22f   :  { %v2850_v58 = vcombine.low %v666_v45, %v670_v47 }
 0x230   :  { %3201 = vrot.lane.b32.xlu1 %v3200_v49, %s3504_s10  ;;  %v667_v49 = vld [vmem:[#allocation2 + $0x18] sm:$0xff] }
 0x231   :  { %v2852_v59 = vcombine.low %v667_v49, %v671_v50 }
 0x2a2   :  { %v3202_v48 = vpop.permute.xlu1 %3201 }
 0x2a3   :  { %v3204_v52 = vunpack.i.h.bf16 %v3202_v48  ;;  %v3203_v53 = vunpack.i.l.bf16 %v3202_v48  ;;  %v2858_v48 = vcombine.low %v674_v36, %v678_v37 }
 0x2a5   :  { %v660_v54 = vsel %vm659_vm12, %v555_v43, %v3204_v52  ;;  %v661_v56 = vsel %vm659_vm12, %v649_v51, %v3203_v53  ;;  %v2859_v43 = vcombine.high %v674_v36, %v678_v37  ;;  %v2851_v52 = vcombine.high %v666_v45, %v670_v47  ;;  %v750_v36 = vld [vmem:[#allocation2 + $0x2b0] sm:$0xff]  ;;  %v747_v37 = vld [vmem:[#allocation2 + $0x298] sm:$0xff] }
 0x2a6   :  { %v3734_v60 = vpack.c.bf16 %v660_v54, %v660_v54  ;;  %v663_v61 = vpack.c.bf16 %v661_v56, %v661_v56  ;;  %v2853_v53 = vcombine.high %v667_v49, %v671_v50  ;;  %v790_v54 = vld [vmem:[#allocation2 + $0x3f0] sm:$0xff]  ;;  %v787_v56 = vld [vmem:[#allocation2 + $0x3d8] sm:$0xff] }
 0x2a7   :  { %v2973_v62 = vcombine.high %v787_v56, %v791_v57  ;;  %v2970_v7 = vcombine.low %v786_v46, %v790_v54  ;;  %v742_v45 = vld [vmem:[#allocation2 + $0x270] sm:$0xff]  ;;  %v739_v47 = vld [vmem:[#allocation2 + $0x258] sm:$0xff] }
 0x2a8   :  { %1506 = vmatprep.mubr.bf16.mxu0 %v663_v61  ;;  %1547 = vmatprep.mubr.bf16.mxu1 %v663_v61  ;;  %v743_v49 = vld [vmem:[#allocation2 + $0x278] sm:$0xff] }
 0x2a9   :  { %1507 = vmatmul.mubr.bf16.vlgmr.msra.gmra.mxu0 %v3734_v60  ;;  %1548 = vmatmul.mubr.bf16.vlgmr.msra.gmra.mxu1 %v3734_v60 }
 0x2aa   :  { %1557 = vmatpush1.bf16.msra.mxu0 %v2906_v38  ;;  %1598 = vmatpush1.bf16.msra.mxu1 %v2908_v40  ;;  %v675_v38 = vld [vmem:[#allocation2 + $0x58] sm:$0xff] }
 0x2ab   :  { %1588 = vmatprep.mubr.bf16.mxu0 %v663_v61  ;;  %1629 = vmatprep.mubr.bf16.mxu1 %v663_v61  ;;  %v679_v40 = vld [vmem:[#allocation2 + $0x78] sm:$0xff]  ;;  %v2971_v61 = vcombine.high %v786_v46, %v790_v54  ;;  %v734_v46 = vld [vmem:[#allocation2 + $0x230] sm:$0xff] }
 0x2ac   :  { %1558 = vmatprep.subr.bf16.mxu0 %v2899_v63  ;;  %1599 = vmatprep.subr.bf16.mxu1 %v2901_v4  ;;  %v2861_v44 = vcombine.high %v675_v38, %v679_v40  ;;  %v2860_v51 = vcombine.low %v675_v38, %v679_v40  ;;  %v778_v63 = vld [vmem:[#allocation2 + $0x390] sm:$0xff]  ;;  %v751_v38 = vld [vmem:[#allocation2 + $0x2b8] sm:$0xff] }
 0x2ad   :  { %v782_v4 = vld [vmem:[#allocation2 + $0x3b0] sm:$0xff]  ;;  %v731_v54 = vld [vmem:[#allocation2 + $0x218] sm:$0xff] }
 0x2ae   :  { %1559 = vmatpush1.bf16.msra.mxu0 %v2898_v55  ;;  %1600 = vmatpush1.bf16.msra.mxu1 %v2900_v8  ;;  %v2972_v55 = vcombine.low %v787_v56, %v791_v57  ;;  %v2963_v8 = vcombine.high %v778_v63, %v782_v4  ;;  %v2962_v15 = vcombine.low %v778_v63, %v782_v4  ;;  %v735_v56 = vld [vmem:[#allocation2 + $0x238] sm:$0xff] }
 0x2af   :  { %1560 = vmatprep.subr.bf16.mxu0 %v2891_v9  ;;  %1601 = vmatprep.subr.bf16.mxu1 %v2893_v10  ;;  %v2965_v9 = vcombine.high %v779_v5, %v783_v6  ;;  %v770_v10 = vld [vmem:[#allocation2 + $0x350] sm:$0xff]  ;;  %v2916_v63 = vcombine.low %v731_v54, %v735_v56 }
 0x2b0   :  { %v2954_v24 = vcombine.low %v770_v10, %v774_v11  ;;  %v3208_v4 = vld [vmem:[#allocation5 + $0x74] ss:$8 sps:$4 sm:$0xff]  }
 0x2b2   :  { %1561 = vmatpush1.bf16.msra.mxu0 %v2890_v16  ;;  %1602 = vmatpush1.bf16.msra.mxu1 %v2892_v17  ;;  %v2964_v16 = vcombine.low %v779_v5, %v783_v6  ;;  %v2955_v17 = vcombine.high %v770_v10, %v774_v11  ;;  %v3211_v5 = vld [vmem:[#allocation5 + $0x174] ss:$8 sps:$4 sm:$0xff]   ;;  %v3206_v6 = vld [vmem:[#allocation5 + $0x70] ss:$8 sps:$4 sm:$0xff]   ;;  %v3215_v10 = vld [vmem:[#allocation5 + $0x160] ss:$8 sps:$4 sm:$0xff]  }
 0x2b3   :  { %1562 = vmatprep.subr.bf16.mxu0 %v2883_v28  ;;  %1603 = vmatprep.subr.bf16.mxu1 %v2885_v18  ;;  %v2957_v28 = vcombine.high %v771_v12, %v775_v13  ;;  %v762_v18 = vld [vmem:[#allocation2 + $0x310] sm:$0xff] }
 0x2b4   :  { %v2946_v39 = vcombine.low %v762_v18, %v766_v20  ;;  %v3220_v11 = vld [vmem:[#allocation5 + $0x54] ss:$8 sps:$4 sm:$0xff]  }
 0x2b6   :  { %1563 = vmatpush1.bf16.msra.mxu0 %v2882_v25  ;;  %1604 = vmatpush1.bf16.msra.mxu1 %v2884_v26  ;;  %v2956_v25 = vcombine.low %v771_v12, %v775_v13  ;;  %v2947_v26 = vcombine.high %v762_v18, %v766_v20  ;;  %v3223_v12 = vld [vmem:[#allocation5 + $0x154] ss:$8 sps:$4 sm:$0xff]   ;;  %v3218_v13 = vld [vmem:[#allocation5 + $0x50] ss:$8 sps:$4 sm:$0xff]  }
 0x2b7   :  { %1564 = vmatprep.subr.bf16.mxu0 %v2875_v0  ;;  %1605 = vmatprep.subr.bf16.mxu1 %v2877_v27  ;;  %v2949_v0 = vcombine.high %v763_v22, %v767_v23  ;;  %v754_v27 = vld [vmem:[#allocation2 + $0x2d0] sm:$0xff] }
 0x2b8   :  { %v2938_v40 = vcombine.low %v754_v27, %v758_v29  ;;  %v3232_v18 = vld [vmem:[#allocation5 + $0x34] ss:$8 sps:$4 sm:$0xff]  }
 0x2b9   :  { %v3235_v20 = vld [vmem:[#allocation5 + $0x134] ss:$8 sps:$4 sm:$0xff]  }
 0x2ba   :  { %1565 = vmatpush1.bf16.msra.mxu0 %v2874_v32  ;;  %1606 = vmatpush1.bf16.msra.mxu1 %v2876_v33  ;;  %v2948_v32 = vcombine.low %v763_v22, %v767_v23  ;;  %v2939_v33 = vcombine.high %v754_v27, %v758_v29  ;;  %v3230_v22 = vld [vmem:[#allocation5 + $0x30] ss:$8 sps:$4 sm:$0xff]   ;;  %v3244_v27 = vld [vmem:[#allocation5 + $0x14] ss:$8 sps:$4 sm:$0xff]  }
 0x2bb   :  { %1566 = vmatprep.subr.bf16.mxu0 %v2867_v34  ;;  %1607 = vmatprep.subr.bf16.mxu1 %v2869_v35  ;;  %v2941_v34 = vcombine.high %v755_v30, %v759_v31  ;;  %v746_v35 = vld [vmem:[#allocation2 + $0x290] sm:$0xff] }
 0x2bc   :  { %v2930_v50 = vcombine.low %v746_v35, %v750_v36  ;;  %v3233_v23 = vld [vmem:[#allocation5 + $0x130] ss:$8 sps:$4 sm:$0xff]   ;;  %v3247_v29 = vld [vmem:[#allocation5 + $0x114] ss:$8 sps:$4 sm:$0xff]  }
 0x2be   :  { %1567 = vmatpush1.bf16.msra.mxu0 %v2866_v41  ;;  %1608 = vmatpush1.bf16.msra.mxu1 %v2868_v42  ;;  %v2940_v41 = vcombine.low %v755_v30, %v759_v31  ;;  %v2931_v42 = vcombine.high %v746_v35, %v750_v36  ;;  %v3242_v30 = vld [vmem:[#allocation5 + $0x10] ss:$8 sps:$4 sm:$0xff]   ;;  %v3256_v35 = vld [vmem:[#allocation5 + $0xf4] ss:$8 sps:$4 sm:$0xff]  }
 0x2bf   :  { %1568 = vmatprep.subr.bf16.mxu0 %v2859_v43  ;;  %1609 = vmatprep.subr.bf16.mxu1 %v2861_v44  ;;  %v2933_v43 = vcombine.high %v747_v37, %v751_v38  ;;  %v738_v44 = vld [vmem:[#allocation2 + $0x250] sm:$0xff] }
 0x2c0   :  { %v2922_v57 = vcombine.low %v738_v44, %v742_v45  ;;  %v3245_v31 = vld [vmem:[#allocation5 + $0x110] ss:$8 sps:$4 sm:$0xff]   ;;  %v3259_v36 = vld [vmem:[#allocation5 + $0x1f4] ss:$8 sps:$4 sm:$0xff]  }
 0x2c2   :  { %1569 = vmatpush1.bf16.msra.mxu0 %v2858_v48  ;;  %1610 = vmatpush1.bf16.msra.mxu1 %v2860_v51  ;;  %v2932_v48 = vcombine.low %v747_v37, %v751_v38  ;;  %v2923_v51 = vcombine.high %v738_v44, %v742_v45  ;;  %v3254_v37 = vld [vmem:[#allocation5 + $0xf0] ss:$8 sps:$4 sm:$0xff]   ;;  %v3268_v44 = vld [vmem:[#allocation5 + $0xd4] ss:$8 sps:$4 sm:$0xff]  }
 0x2c3   :  { %1570 = vmatprep.subr.bf16.mxu0 %v2851_v52  ;;  %1611 = vmatprep.subr.bf16.mxu1 %v2853_v53  ;;  %v2925_v52 = vcombine.high %v739_v47, %v743_v49  ;;  %v730_v53 = vld [vmem:[#allocation2 + $0x210] sm:$0xff] }
 0x2c4   :  { %v3257_v38 = vld [vmem:[#allocation5 + $0x1f0] ss:$8 sps:$4 sm:$0xff]   ;;  %v3271_v45 = vld [vmem:[#allocation5 + $0x1d4] ss:$8 sps:$4 sm:$0xff]  }
 0x2c6   :  { %1571 = vmatpush1.bf16.msra.mxu0 %v2850_v58  ;;  %1612 = vmatpush1.bf16.msra.mxu1 %v2852_v59  ;;  %v2924_v58 = vcombine.low %v739_v47, %v743_v49  ;;  %v2915_v59 = vcombine.high %v730_v53, %v734_v46  ;;  %v3266_v47 = vld [vmem:[#allocation5 + $0xd0] ss:$8 sps:$4 sm:$0xff]  }
 0x2c7   :  { %1572 = vmatprep.subr.bf16.mxu0 %v2971_v61  ;;  %1613 = vmatprep.subr.bf16.mxu1 %v2973_v62  ;;  %v2917_v61 = vcombine.high %v731_v54, %v735_v56  ;;  %v2914_v62 = vcombine.low %v730_v53, %v734_v46  ;;  %v3269_v49 = vld [vmem:[#allocation5 + $0x1d0] ss:$8 sps:$4 sm:$0xff]   ;;  %v3280_v53 = vld [vmem:[#allocation5 + $0xb4] ss:$8 sps:$4 sm:$0xff]  }
 0x2c8   :  { %v3283_v46 = vld [vmem:[#allocation5 + $0x1b4] ss:$8 sps:$4 sm:$0xff]   ;;  %v3278_v54 = vld [vmem:[#allocation5 + $0xb0] ss:$8 sps:$4 sm:$0xff]  }
 0x2c9   :  { %v3281_v56 = vld [vmem:[#allocation5 + $0x1b0] ss:$8 sps:$4 sm:$0xff]  }
 0x2ca   :  { %1573 = vmatpush2.bf16.msra.mxu0 %v2970_v7  ;;  %1614 = vmatpush2.bf16.msra.mxu1 %v2972_v55  ;;  %v3209_v7 = vld [vmem:[#allocation5 + $0x170] ss:$8 sps:$4 sm:$0xff]   ;;  %v3214_v55 = vld [vmem:[#allocation5 + $0x64] ss:$8 sps:$4 sm:$0xff]  }
 0x2cb   :  { %1574 = vmatprep.subr.bf16.mxu0 %v2963_v8  ;;  %1615 = vmatprep.subr.bf16.mxu1 %v2965_v9  ;;  %v3217_v8 = vld [vmem:[#allocation5 + $0x164] ss:$8 sps:$4 sm:$0xff]   ;;  %v3212_v9 = vld [vmem:[#allocation5 + $0x60] ss:$8 sps:$4 sm:$0xff]  }
 0x2ce   :  { %1575 = vmatpush2.bf16.msra.mxu0 %v2962_v15  ;;  %1616 = vmatpush2.bf16.msra.mxu1 %v2964_v16  ;;  %v3221_v15 = vld [vmem:[#allocation5 + $0x150] ss:$8 sps:$4 sm:$0xff]   ;;  %v3226_v16 = vld [vmem:[#allocation5 + $0x44] ss:$8 sps:$4 sm:$0xff]  }
 0x2cf   :  { %1576 = vmatprep.subr.bf16.mxu0 %v2955_v17  ;;  %1617 = vmatprep.subr.bf16.mxu1 %v2957_v28  ;;  %v3229_v17 = vld [vmem:[#allocation5 + $0x144] ss:$8 sps:$4 sm:$0xff]   ;;  %v3224_v28 = vld [vmem:[#allocation5 + $0x40] ss:$8 sps:$4 sm:$0xff]  }
 0x2d2   :  { %1577 = vmatpush2.bf16.msra.mxu0 %v2954_v24  ;;  %1618 = vmatpush2.bf16.msra.mxu1 %v2956_v25  ;;  %v3238_v24 = vld [vmem:[#allocation5 + $0x24] ss:$8 sps:$4 sm:$0xff]  }
 0x2d3   :  { %1578 = vmatprep.subr.bf16.mxu0 %v2947_v26  ;;  %1619 = vmatprep.subr.bf16.mxu1 %v2949_v0  ;;  %v3241_v25 = vld [vmem:[#allocation5 + $0x124] ss:$8 sps:$4 sm:$0xff]   ;;  %v3236_v26 = vld [vmem:[#allocation5 + $0x20] ss:$8 sps:$4 sm:$0xff]  }
 0x2d4   :  { %v3239_v0 = vld [vmem:[#allocation5 + $0x120] ss:$8 sps:$4 sm:$0xff]  }
 0x2d6   :  { %1579 = vmatpush2.bf16.msra.mxu0 %v2946_v39  ;;  %1620 = vmatpush2.bf16.msra.mxu1 %v2948_v32  ;;  %v3250_v39 = vld [vmem:[#allocation5 + $0x4] ss:$8 sps:$4 sm:$0xff]  }
 0x2d7   :  { %1580 = vmatprep.subr.bf16.mxu0 %v2939_v33  ;;  %1621 = vmatprep.subr.bf16.mxu1 %v2941_v34  ;;  %v3253_v32 = vld [vmem:[#allocation5 + $0x104] ss:$8 sps:$4 sm:$0xff]   ;;  %v3248_v33 = vld [vmem:[#allocation5] ss:$8 sps:$4 sm:$0xff]  }
 0x2d8   :  { %v3251_v34 = vld [vmem:[#allocation5 + $0x100] ss:$8 sps:$4 sm:$0xff]  }
 0x2da   :  { %1581 = vmatpush2.bf16.msra.mxu0 %v2938_v40  ;;  %1622 = vmatpush2.bf16.msra.mxu1 %v2940_v41  ;;  %v3262_v40 = vld [vmem:[#allocation5 + $0xe4] ss:$8 sps:$4 sm:$0xff]  }
 0x2db   :  { %1582 = vmatprep.subr.bf16.mxu0 %v2931_v42  ;;  %1623 = vmatprep.subr.bf16.mxu1 %v2933_v43  ;;  %v3265_v41 = vld [vmem:[#allocation5 + $0x1e4] ss:$8 sps:$4 sm:$0xff]   ;;  %v3260_v42 = vld [vmem:[#allocation5 + $0xe0] ss:$8 sps:$4 sm:$0xff]  }
 0x2dc   :  { %v3263_v43 = vld [vmem:[#allocation5 + $0x1e0] ss:$8 sps:$4 sm:$0xff]  }
 0x2de   :  { %1583 = vmatpush2.bf16.msra.mxu0 %v2930_v50  ;;  %1624 = vmatpush2.bf16.msra.mxu1 %v2932_v48  ;;  %v3274_v50 = vld [vmem:[#allocation5 + $0xc4] ss:$8 sps:$4 sm:$0xff]  }
 0x2df   :  { %1584 = vmatprep.subr.bf16.mxu0 %v2923_v51  ;;  %1625 = vmatprep.subr.bf16.mxu1 %v2925_v52  ;;  %v3277_v48 = vld [vmem:[#allocation5 + $0x1c4] ss:$8 sps:$4 sm:$0xff]   ;;  %v3272_v51 = vld [vmem:[#allocation5 + $0xc0] ss:$8 sps:$4 sm:$0xff]  }
 0x2e0   :  { %v3275_v52 = vld [vmem:[#allocation5 + $0x1c0] ss:$8 sps:$4 sm:$0xff]  }
 0x2e2   :  { %1585 = vmatpush2.bf16.msra.mxu0 %v2922_v57  ;;  %1626 = vmatpush2.bf16.msra.mxu1 %v2924_v58  ;;  %v3286_v57 = vld [vmem:[#allocation5 + $0xa4] ss:$8 sps:$4 sm:$0xff]  }
 0x2e3   :  { %1586 = vmatprep.subr.bf16.mxu0 %v2915_v59  ;;  %1627 = vmatprep.subr.bf16.mxu1 %v2917_v61  ;;  %v3289_v58 = vld [vmem:[#allocation5 + $0x1a4] ss:$8 sps:$4 sm:$0xff]   ;;  %v3284_v59 = vld [vmem:[#allocation5 + $0xa0] ss:$8 sps:$4 sm:$0xff]  }
 0x2e4   :  { %v3287_v61 = vld [vmem:[#allocation5 + $0x1a0] ss:$8 sps:$4 sm:$0xff]  }
 0x2e6   :  { %1587 = vmatpush2.bf16.msra.mxu0 %v2914_v62  ;;  %1628 = vmatpush2.bf16.msra.mxu1 %v2916_v63  ;;  %v3292_v62 = vld [vmem:[#allocation5 + $0x94] ss:$8 sps:$4 sm:$0xff]  }
 0x2e7   :  { %2434 = vmatprep.subr.bf16.mxu0 %v3208_v4  ;;  %2475 = vmatprep.subr.bf16.mxu1 %v3211_v5  ;;  %v3295_v63 = vld [vmem:[#allocation5 + $0x194] ss:$8 sps:$4 sm:$0xff]   ;;  %v3290_v4 = vld [vmem:[#allocation5 + $0x90] ss:$8 sps:$4 sm:$0xff]  }
 0x2e8   :  { %v3293_v5 = vld [vmem:[#allocation5 + $0x190] ss:$8 sps:$4 sm:$0xff]  }
 0x2e9   :  { %1589 = vmatmul.mubr.bf16.vlgmr.msra.gmra.mxu0 %v3734_v60  ;;  %1630 = vmatmul.mubr.bf16.vlgmr.msra.gmra.mxu1 %v3734_v60  ;;  %v3227_v60 = vld [vmem:[#allocation5 + $0x140] ss:$8 sps:$4 sm:$0xff]  }
 0x2ea   :  { %2435 = vmatpush1.bf16.msra.mxu0 %v3206_v6  ;;  %2476 = vmatpush1.bf16.msra.mxu1 %v3209_v7  ;;  %v3298_v6 = vld [vmem:[#allocation5 + $0x84] ss:$8 sps:$4 sm:$0xff]  }
 0x2eb   :  { %2436 = vmatprep.subr.bf16.mxu0 %v3214_v55  ;;  %2477 = vmatprep.subr.bf16.mxu1 %v3217_v8  ;;  %v3301_v7 = vld [vmem:[#allocation5 + $0x184] ss:$8 sps:$4 sm:$0xff]   ;;  %v3296_v55 = vld [vmem:[#allocation5 + $0x80] ss:$8 sps:$4 sm:$0xff]  }
 0x2ec   :  { %v3299_v8 = vld [vmem:[#allocation5 + $0x180] ss:$8 sps:$4 sm:$0xff]  }
 0x2ee   :  { %2437 = vmatpush1.bf16.msra.mxu0 %v3212_v9  ;;  %2478 = vmatpush1.bf16.msra.mxu1 %v3215_v10  ;;  %v3304_v9 = vld [vmem:[#allocation5 + $0x274] ss:$8 sps:$4 sm:$0xff]  }
 0x2ef   :  { %2438 = vmatprep.subr.bf16.mxu0 %v3220_v11  ;;  %2479 = vmatprep.subr.bf16.mxu1 %v3223_v12  ;;  %v3307_v10 = vld [vmem:[#allocation5 + $0x374] ss:$8 sps:$4 sm:$0xff]   ;;  %v3743_v11 = vld [vmem:[%s3900_s15] sm:$0xff]  ;;  %s3507_s15 = smov [#allocation7]  }
 0x2f0   :  { %v797_v12 = vrot.slane %v3743_v11, %v3627_v3  ;;  %s2828_s21 = sshll.u32 %s3507_s15, 4  ;;  %s2829_s21 = int_to_ptr.vmem [resolvable:$true] %s2828_s21 }
 0x2f1   :  { %s3468_s9 = scalar_lea.vmem %s2829_s21, 16  ;;  %s3472_s2 = scalar_lea.vmem %s2829_s21, 32 }
 0x2f2   :  { %2439 = vmatpush1.bf16.msra.mxu0 %v3218_v13  ;;  %2480 = vmatpush1.bf16.msra.mxu1 %v3221_v15  ;;  %v805_v13 = vrot.slane %v3743_v11, %v3671_v19  ;;  %v801_v15 = vrot.slane %v3743_v11, %v3653_v14  ;;  %p3469_p10 = scmp.ne.s32.totalorder %s2829_s21, %s3468_s9  ;;  %p3473_p11 = scmp.lt.s32.totalorder %s2829_s21, %s2829_s21 }
 0x2f3   :  { %2440 = vmatprep.subr.bf16.mxu0 %v3226_v16  ;;  %2481 = vmatprep.subr.bf16.mxu1 %v3229_v17  ;;  %v809_v16 = vrot.slane %v3743_v11, %v199_v21  ;;  %v3305_v21 = vld [vmem:[#allocation5 + $0x370] ss:$8 sps:$4 sm:$0xff]   ;;  %p3474_p12 = scmp.lt.s32.totalorder %s3472_s2, %s3468_s9 }
 0x2f5   :  { %p3475_p13 = por %p3474_p12, %p3473_p11 }
 0x2f6   :  { %2441 = vmatpush1.bf16.msra.mxu0 %v3224_v28  ;;  %2482 = vmatpush1.bf16.msra.mxu1 %v3227_v60 }
 0x2f7   :  { %2442 = vmatprep.subr.bf16.mxu0 %v3232_v18  ;;  %2483 = vmatprep.subr.bf16.mxu1 %v3235_v20  ;;  %p3476_p0 = pnand %p3475_p13, %p3469_p10 }
 0x2fa   :  { %2443 = vmatpush1.bf16.msra.mxu0 %v3230_v22  ;;  %2484 = vmatpush1.bf16.msra.mxu1 %v3233_v23 }
 0x2fb   :  { %2444 = vmatprep.subr.bf16.mxu0 %v3238_v24  ;;  %2485 = vmatprep.subr.bf16.mxu1 %v3241_v25 }
 0x2fe   :  { %2445 = vmatpush1.bf16.msra.mxu0 %v3236_v26  ;;  %2486 = vmatpush1.bf16.msra.mxu1 %v3239_v0 }
 0x2ff   :  { %2446 = vmatprep.subr.bf16.mxu0 %v3244_v27  ;;  %2487 = vmatprep.subr.bf16.mxu1 %v3247_v29 }
 0x302   :  { %2447 = vmatpush1.bf16.msra.mxu0 %v3242_v30  ;;  %2488 = vmatpush1.bf16.msra.mxu1 %v3245_v31 }
 0x303   :  { %2448 = vmatprep.subr.bf16.mxu0 %v3250_v39  ;;  %2489 = vmatprep.subr.bf16.mxu1 %v3253_v32 }
 0x306   :  { %2449 = vmatpush1.bf16.msra.mxu0 %v3248_v33  ;;  %2490 = vmatpush1.bf16.msra.mxu1 %v3251_v34  ;;  %v3302_v33 = vld [vmem:[#allocation5 + $0x270] ss:$8 sps:$4 sm:$0xff]  }
 0x307   :  { %2450 = vmatprep.subr.bf16.mxu0 %v3256_v35  ;;  %2491 = vmatprep.subr.bf16.mxu1 %v3259_v36  ;;  %v3310_v36 = vld [vmem:[#allocation5 + $0x264] ss:$8 sps:$4 sm:$0xff]  }
 0x30a   :  { %2451 = vmatpush2.bf16.msra.mxu0 %v3254_v37  ;;  %2492 = vmatpush2.bf16.msra.mxu1 %v3257_v38  ;;  %v3313_v37 = vld [vmem:[#allocation5 + $0x364] ss:$8 sps:$4 sm:$0xff]   ;;  %v3308_v38 = vld [vmem:[#allocation5 + $0x260] ss:$8 sps:$4 sm:$0xff]  }
 0x30b   :  { %2452 = vmatprep.subr.bf16.mxu0 %v3262_v40  ;;  %2493 = vmatprep.subr.bf16.mxu1 %v3265_v41  ;;  %v3311_v40 = vld [vmem:[#allocation5 + $0x360] ss:$8 sps:$4 sm:$0xff]   ;;  %v3316_v41 = vld [vmem:[#allocation5 + $0x254] ss:$8 sps:$4 sm:$0xff]  }
 0x30e   :  { %2453 = vmatpush2.bf16.msra.mxu0 %v3260_v42  ;;  %2494 = vmatpush2.bf16.msra.mxu1 %v3263_v43  ;;  %v3319_v42 = vld [vmem:[#allocation5 + $0x354] ss:$8 sps:$4 sm:$0xff]   ;;  %v3314_v43 = vld [vmem:[#allocation5 + $0x250] ss:$8 sps:$4 sm:$0xff]  }
 0x30f   :  { %2454 = vmatprep.subr.bf16.mxu0 %v3268_v44  ;;  %2495 = vmatprep.subr.bf16.mxu1 %v3271_v45  ;;  %v3317_v44 = vld [vmem:[#allocation5 + $0x350] ss:$8 sps:$4 sm:$0xff]   ;;  %v3322_v45 = vld [vmem:[#allocation5 + $0x244] ss:$8 sps:$4 sm:$0xff]  }
 0x312   :  { %2455 = vmatpush2.bf16.msra.mxu0 %v3266_v47  ;;  %2496 = vmatpush2.bf16.msra.mxu1 %v3269_v49  ;;  %v3325_v47 = vld [vmem:[#allocation5 + $0x344] ss:$8 sps:$4 sm:$0xff]   ;;  %v3320_v49 = vld [vmem:[#allocation5 + $0x240] ss:$8 sps:$4 sm:$0xff]  }
 0x313   :  { %2456 = vmatprep.subr.bf16.mxu0 %v3274_v50  ;;  %2497 = vmatprep.subr.bf16.mxu1 %v3277_v48  ;;  %v3323_v50 = vld [vmem:[#allocation5 + $0x340] ss:$8 sps:$4 sm:$0xff]   ;;  %v3328_v48 = vld [vmem:[#allocation5 + $0x234] ss:$8 sps:$4 sm:$0xff]  }
 0x316   :  { %2457 = vmatpush2.bf16.msra.mxu0 %v3272_v51  ;;  %2498 = vmatpush2.bf16.msra.mxu1 %v3275_v52  ;;  %v3331_v51 = vld [vmem:[#allocation5 + $0x334] ss:$8 sps:$4 sm:$0xff]   ;;  %v3326_v52 = vld [vmem:[#allocation5 + $0x230] ss:$8 sps:$4 sm:$0xff]  }
 0x317   :  { %2458 = vmatprep.subr.bf16.mxu0 %v3280_v53  ;;  %2499 = vmatprep.subr.bf16.mxu1 %v3283_v46  ;;  %v3329_v53 = vld [vmem:[#allocation5 + $0x330] ss:$8 sps:$4 sm:$0xff]   ;;  %v3334_v46 = vld [vmem:[#allocation5 + $0x224] ss:$8 sps:$4 sm:$0xff]  }
 0x31a   :  { %2459 = vmatpush2.bf16.msra.mxu0 %v3278_v54  ;;  %2500 = vmatpush2.bf16.msra.mxu1 %v3281_v56  ;;  %v3337_v54 = vld [vmem:[#allocation5 + $0x324] ss:$8 sps:$4 sm:$0xff]   ;;  %v3332_v56 = vld [vmem:[#allocation5 + $0x220] ss:$8 sps:$4 sm:$0xff]  }
 0x31b   :  { %2460 = vmatprep.subr.bf16.mxu0 %v3286_v57  ;;  %2501 = vmatprep.subr.bf16.mxu1 %v3289_v58  ;;  %v3335_v57 = vld [vmem:[#allocation5 + $0x320] ss:$8 sps:$4 sm:$0xff]   ;;  %v3340_v58 = vld [vmem:[#allocation5 + $0x214] ss:$8 sps:$4 sm:$0xff]  }
 0x31e   :  { %2461 = vmatpush2.bf16.msra.mxu0 %v3284_v59  ;;  %2502 = vmatpush2.bf16.msra.mxu1 %v3287_v61  ;;  %v3343_v59 = vld [vmem:[#allocation5 + $0x314] ss:$8 sps:$4 sm:$0xff]   ;;  %v3338_v61 = vld [vmem:[#allocation5 + $0x210] ss:$8 sps:$4 sm:$0xff]  }
 0x31f   :  { %2462 = vmatprep.subr.bf16.mxu0 %v3292_v62  ;;  %2503 = vmatprep.subr.bf16.mxu1 %v3295_v63  ;;  %v3341_v62 = vld [vmem:[#allocation5 + $0x310] ss:$8 sps:$4 sm:$0xff]   ;;  %v3346_v63 = vld [vmem:[#allocation5 + $0x204] ss:$8 sps:$4 sm:$0xff]  }
 0x322   :  { %2463 = vmatpush2.bf16.msra.mxu0 %v3290_v4  ;;  %2504 = vmatpush2.bf16.msra.mxu1 %v3293_v5  ;;  %v3349_v4 = vld [vmem:[#allocation5 + $0x304] ss:$8 sps:$4 sm:$0xff]   ;;  %v3344_v5 = vld [vmem:[#allocation5 + $0x200] ss:$8 sps:$4 sm:$0xff]  }
 0x323   :  { %2464 = vmatprep.subr.bf16.mxu0 %v3298_v6  ;;  %2505 = vmatprep.subr.bf16.mxu1 %v3301_v7  ;;  %v3347_v6 = vld [vmem:[#allocation5 + $0x300] ss:$8 sps:$4 sm:$0xff]   ;;  %v3352_v7 = vld [vmem:[#allocation5 + $0x2f4] ss:$8 sps:$4 sm:$0xff]  }
 0x326   :  { %2465 = vmatpush2.bf16.msra.mxu0 %v3296_v55  ;;  %2506 = vmatpush2.bf16.msra.mxu1 %v3299_v8  ;;  %v3355_v55 = vld [vmem:[#allocation5 + $0x3f4] ss:$8 sps:$4 sm:$0xff]   ;;  %v3350_v8 = vld [vmem:[#allocation5 + $0x2f0] ss:$8 sps:$4 sm:$0xff]  }
 0x327   :  { %2516 = vmatprep.subr.bf16.mxu0 %v3304_v9  ;;  %2557 = vmatprep.subr.bf16.mxu1 %v3307_v10  ;;  %v3353_v9 = vld [vmem:[#allocation5 + $0x3f0] ss:$8 sps:$4 sm:$0xff]   ;;  %v3358_v10 = vld [vmem:[#allocation5 + $0x2e4] ss:$8 sps:$4 sm:$0xff]  }
 0x369   :  { %v1508_v17 = vpop.f32.mrf.mxu0  ;;  %v1549_v28 = vpop.f32.mrf.mxu1 }
 0x36a   :  { %v1509_v60 = vadd.f32 %v1508_v17, %v797_v12  ;;  %v1550_v18 = vadd.f32 %v1549_v28, %v805_v13  ;;  %v3361_v12 = vld [vmem:[#allocation5 + $0x3e4] ss:$8 sps:$4 sm:$0xff]   ;;  %v3356_v13 = vld [vmem:[#allocation5 + $0x2e0] ss:$8 sps:$4 sm:$0xff]   ;;  %v3367_v17 = vld [vmem:[#allocation5 + $0x3d4] ss:$8 sps:$4 sm:$0xff]  }
 0x36b   :  { %v1510_v20 = vpop.f32.mrf.mxu0  ;;  %v1551_v22 = vpop.f32.mrf.mxu1  ;;  %v3362_v28 = vld [vmem:[#allocation5 + $0x2d0] ss:$8 sps:$4 sm:$0xff]  }
 0x36c   :  { %v1511_v23 = vadd.f32 %v1510_v20, %v801_v15  ;;  %v1552_v24 = vadd.f32 %v1551_v22, %v809_v16  ;;  %v1638_v25 = vmax.f32 %v1509_v60, 0.0  ;;  %v1640_v26 = vmax.f32 %v1550_v18, 0.0  ;;  %v3359_v15 = vld [vmem:[#allocation5 + $0x3e0] ss:$8 sps:$4 sm:$0xff]   ;;  %v3364_v16 = vld [vmem:[#allocation5 + $0x2d4] ss:$8 sps:$4 sm:$0xff]  }
 0x36d   :  { %v1512_v0 = vpop.f32.mrf.mxu0  ;;  %v1553_v27 = vpop.f32.mrf.mxu1  ;;  %v3365_v60 = vld [vmem:[#allocation5 + $0x3d0] ss:$8 sps:$4 sm:$0xff]   ;;  %v3370_v18 = vld [vmem:[#allocation5 + $0x2c4] ss:$8 sps:$4 sm:$0xff]   ;;  %v3368_v22 = vld [vmem:[#allocation5 + $0x2c0] ss:$8 sps:$4 sm:$0xff]  }
 0x36e   :  { %v1639_v19 = vmax.f32 %v1511_v23, 0.0  ;;  %v1641_v29 = vmax.f32 %v1552_v24, 0.0  ;;  %v1646_v34 = vpack.c.bf16 %v1638_v25, %v1638_v25  ;;  %v1648_v35 = vpack.c.bf16 %v1640_v26, %v1640_v26  ;;  %v3373_v20 = vld [vmem:[#allocation5 + $0x3c4] ss:$8 sps:$4 sm:$0xff]   ;;  %v3371_v23 = vld [vmem:[#allocation5 + $0x3c0] ss:$8 sps:$4 sm:$0xff]  }
 0x36f   :  { %v1513_v30 = vpop.f32.mrf.mxu0  ;;  %v1554_v31 = vpop.f32.mrf.mxu1  ;;  %v3376_v24 = vld [vmem:[#allocation5 + $0x2b4] ss:$8 sps:$4 sm:$0xff]   ;;  %v3374_v26 = vld [vmem:[#allocation5 + $0x2b0] ss:$8 sps:$4 sm:$0xff]   ;;  %v3382_v27 = vld [vmem:[#allocation5 + $0x2a4] ss:$8 sps:$4 sm:$0xff]  }
 0x370   :  { %v1647_v39 = vpack.c.bf16 %v1639_v19, %v1639_v19  ;;  %v1649_v32 = vpack.c.bf16 %v1641_v29, %v1641_v29  ;;  %v3379_v25 = vld [vmem:[#allocation5 + $0x3b4] ss:$8 sps:$4 sm:$0xff]   ;;  %v3377_v0 = vld [vmem:[#allocation5 + $0x3b0] ss:$8 sps:$4 sm:$0xff]   ;;  %v3385_v19 = vld [vmem:[#allocation5 + $0x3a4] ss:$8 sps:$4 sm:$0xff]  }
 0x371   :  { %v812_v29 = vsub.s32 4, %v3624_v2  ;;  %v820_v30 = vsub.s32 6, %v3624_v2  ;;  %v3380_v31 = vld [vmem:[#allocation5 + $0x2a0] ss:$8 sps:$4 sm:$0xff]  }
 0x372   :  { %2466 = vmatprep.mubr.bf16.mxu0 %v1647_v39  ;;  %2507 = vmatprep.mubr.bf16.mxu1 %v1649_v32  ;;  %v3383_v39 = vld [vmem:[#allocation5 + $0x3a0] ss:$8 sps:$4 sm:$0xff]   ;;  %v816_v32 = vsub.s32 5, %v3624_v2 }
 0x373   :  { %2467 = vmatmul.mubr.bf16.vlgmr.msra.gmra.mxu0 %v1646_v34  ;;  %2508 = vmatmul.mubr.bf16.vlgmr.msra.gmra.mxu1 %v1648_v35  ;;  %v3391_v34 = vld [vmem:[#allocation5 + $0x394] ss:$8 sps:$4 sm:$0xff]   ;;  %v813_v35 = vrot.slane %v3743_v11, %v812_v29  ;;  %v2604_v29 = vld [vmem:[%s3903_s18 + $0x20] sm:$0xff] }
 0x374   :  { %2517 = vmatpush1.bf16.msra.mxu0 %v3302_v33  ;;  %2558 = vmatpush1.bf16.msra.mxu1 %v3305_v21  ;;  %v824_v33 = vsub.s32 7, %v3624_v2  ;;  %v3388_v21 = vld [vmem:[#allocation5 + $0x294] ss:$8 sps:$4 sm:$0xff]   ;;  %v3394_v2 = vld [vmem:[#allocation5 + $0x284] ss:$8 sps:$4 sm:$0xff]  }
 0x375   :  { %2518 = vmatprep.subr.bf16.mxu0 %v3310_v36  ;;  %2559 = vmatprep.subr.bf16.mxu1 %v3313_v37  ;;  %v821_v36 = vrot.slane %v3743_v11, %v820_v30  ;;  %v817_v37 = vrot.slane %v3743_v11, %v816_v32  ;;  %v2619_v30 = vld [vmem:[%s3903_s18 + $0x98] sm:$0xff]  ;;  %v2602_v32 = vld [vmem:[%s3903_s18 + $0x10] sm:$0xff] }
 0x378   :  { %2519 = vmatpush1.bf16.msra.mxu0 %v3308_v38  ;;  %2560 = vmatpush1.bf16.msra.mxu1 %v3311_v40  ;;  %v825_v38 = vrot.slane %v3743_v11, %v824_v33  ;;  %v3386_v40 = vld [vmem:[#allocation5 + $0x290] ss:$8 sps:$4 sm:$0xff]   ;;  %v2617_v33 = vld [vmem:[%s3903_s18 + $0x88] sm:$0xff] }
 0x379   :  { %2520 = vmatprep.subr.bf16.mxu0 %v3316_v41  ;;  %2561 = vmatprep.subr.bf16.mxu1 %v3319_v42  ;;  %v3389_v41 = vld [vmem:[#allocation5 + $0x390] ss:$8 sps:$4 sm:$0xff]  }
 0x37c   :  { %2521 = vmatpush1.bf16.msra.mxu0 %v3314_v43  ;;  %2562 = vmatpush1.bf16.msra.mxu1 %v3317_v44  ;;  %v3397_v44 = vld [vmem:[#allocation5 + $0x384] ss:$8 sps:$4 sm:$0xff]  }
 0x37d   :  { %2522 = vmatprep.subr.bf16.mxu0 %v3322_v45  ;;  %2563 = vmatprep.subr.bf16.mxu1 %v3325_v47 }
 0x380   :  { %2523 = vmatpush1.bf16.msra.mxu0 %v3320_v49  ;;  %2564 = vmatpush1.bf16.msra.mxu1 %v3323_v50 }
 0x381   :  { %2524 = vmatprep.subr.bf16.mxu0 %v3328_v48  ;;  %2565 = vmatprep.subr.bf16.mxu1 %v3331_v51 }
 0x384   :  { %2525 = vmatpush1.bf16.msra.mxu0 %v3326_v52  ;;  %2566 = vmatpush1.bf16.msra.mxu1 %v3329_v53  ;;  %v3392_v52 = vld [vmem:[#allocation5 + $0x280] ss:$8 sps:$4 sm:$0xff]  }
 0x385   :  { %2526 = vmatprep.subr.bf16.mxu0 %v3334_v46  ;;  %2567 = vmatprep.subr.bf16.mxu1 %v3337_v54  ;;  %v3395_v53 = vld [vmem:[#allocation5 + $0x380] ss:$8 sps:$4 sm:$0xff]  }
 0x388   :  { %2527 = vmatpush1.bf16.msra.mxu0 %v3332_v56  ;;  %2568 = vmatpush1.bf16.msra.mxu1 %v3335_v57 }
 0x389   :  { %2528 = vmatprep.subr.bf16.mxu0 %v3340_v58  ;;  %2569 = vmatprep.subr.bf16.mxu1 %v3343_v59 }
 0x38c   :  { %2529 = vmatpush1.bf16.msra.mxu0 %v3338_v61  ;;  %2570 = vmatpush1.bf16.msra.mxu1 %v3341_v62 }
 0x38d   :  { %2530 = vmatprep.subr.bf16.mxu0 %v3346_v63  ;;  %2571 = vmatprep.subr.bf16.mxu1 %v3349_v4 }
 0x390   :  { %2531 = vmatpush1.bf16.msra.mxu0 %v3344_v5  ;;  %2572 = vmatpush1.bf16.msra.mxu1 %v3347_v6  ;;  %v2631_v6 = vld [vmem:[%s3903_s18 + $0xf8] sm:$0xff] }
 0x391   :  { %2532 = vmatprep.subr.bf16.mxu0 %v3352_v7  ;;  %2573 = vmatprep.subr.bf16.mxu1 %v3355_v55  ;;  %v2615_v7 = vld [vmem:[%s3903_s18 + $0x78] sm:$0xff]  ;;  %v2630_v55 = vld [vmem:[%s3903_s18 + $0xf0] sm:$0xff] }
 0x394   :  { %2533 = vmatpush2.bf16.msra.mxu0 %v3350_v8  ;;  %2574 = vmatpush2.bf16.msra.mxu1 %v3353_v9  ;;  %v2614_v8 = vld [vmem:[%s3903_s18 + $0x70] sm:$0xff]  ;;  %v2629_v9 = vld [vmem:[%s3903_s18 + $0xe8] sm:$0xff] }
 0x395   :  { %2534 = vmatprep.subr.bf16.mxu0 %v3358_v10  ;;  %2575 = vmatprep.subr.bf16.mxu1 %v3361_v12  ;;  %v2613_v10 = vld [vmem:[%s3903_s18 + $0x68] sm:$0xff]  ;;  %v2628_v12 = vld [vmem:[%s3903_s18 + $0xe0] sm:$0xff] }
 0x398   :  { %2535 = vmatpush2.bf16.msra.mxu0 %v3356_v13  ;;  %2576 = vmatpush2.bf16.msra.mxu1 %v3359_v15  ;;  %v2612_v13 = vld [vmem:[%s3903_s18 + $0x60] sm:$0xff]  ;;  %v2627_v15 = vld [vmem:[%s3903_s18 + $0xd8] sm:$0xff] }
 0x399   :  { %2536 = vmatprep.subr.bf16.mxu0 %v3364_v16  ;;  %2577 = vmatprep.subr.bf16.mxu1 %v3367_v17  ;;  %v2611_v16 = vld [vmem:[%s3903_s18 + $0x58] sm:$0xff]  ;;  %v2626_v17 = vld [vmem:[%s3903_s18 + $0xd0] sm:$0xff] }
 0x39c   :  { %2537 = vmatpush2.bf16.msra.mxu0 %v3362_v28  ;;  %2578 = vmatpush2.bf16.msra.mxu1 %v3365_v60  ;;  %v2610_v28 = vld [vmem:[%s3903_s18 + $0x50] sm:$0xff]  ;;  %v2625_v60 = vld [vmem:[%s3903_s18 + $0xc8] sm:$0xff] }
 0x39d   :  { %2538 = vmatprep.subr.bf16.mxu0 %v3370_v18  ;;  %2579 = vmatprep.subr.bf16.mxu1 %v3373_v20  ;;  %v2609_v18 = vld [vmem:[%s3903_s18 + $0x48] sm:$0xff]  ;;  %v2624_v20 = vld [vmem:[%s3903_s18 + $0xc0] sm:$0xff] }
 0x3a0   :  { %2539 = vmatpush2.bf16.msra.mxu0 %v3368_v22  ;;  %2580 = vmatpush2.bf16.msra.mxu1 %v3371_v23  ;;  %v2608_v22 = vld [vmem:[%s3903_s18 + $0x40] sm:$0xff]  ;;  %v2623_v23 = vld [vmem:[%s3903_s18 + $0xb8] sm:$0xff] }
 0x3a1   :  { %2540 = vmatprep.subr.bf16.mxu0 %v3376_v24  ;;  %2581 = vmatprep.subr.bf16.mxu1 %v3379_v25  ;;  %v2607_v24 = vld [vmem:[%s3903_s18 + $0x38] sm:$0xff]  ;;  %v2622_v25 = vld [vmem:[%s3903_s18 + $0xb0] sm:$0xff] }
 0x3a4   :  { %2541 = vmatpush2.bf16.msra.mxu0 %v3374_v26  ;;  %2582 = vmatpush2.bf16.msra.mxu1 %v3377_v0  ;;  %v2606_v26 = vld [vmem:[%s3903_s18 + $0x30] sm:$0xff]  ;;  %v2621_v0 = vld [vmem:[%s3903_s18 + $0xa8] sm:$0xff] }
 0x3a5   :  { %2542 = vmatprep.subr.bf16.mxu0 %v3382_v27  ;;  %2583 = vmatprep.subr.bf16.mxu1 %v3385_v19  ;;  %v2605_v27 = vld [vmem:[%s3903_s18 + $0x28] sm:$0xff]  ;;  %v2620_v19 = vld [vmem:[%s3903_s18 + $0xa0] sm:$0xff] }
 0x3a8   :  { %2543 = vmatpush2.bf16.msra.mxu0 %v3380_v31  ;;  %2584 = vmatpush2.bf16.msra.mxu1 %v3383_v39  ;;  %v2603_v31 = vld [vmem:[%s3903_s18 + $0x18] sm:$0xff]  ;;  %v2618_v39 = vld [vmem:[%s3903_s18 + $0x90] sm:$0xff] }
 0x3a9   :  { %v1590_v42 = vpop.f32.mrf.mxu0  ;;  %v1631_v43 = vpop.f32.mrf.mxu1  ;;  %2544 = vmatprep.subr.bf16.mxu0 %v3388_v21  ;;  %2585 = vmatprep.subr.bf16.mxu1 %v3391_v34  ;;  %v2601_v21 = vld [vmem:[%s3903_s18 + $0x8] sm:$0xff]  ;;  %v2616_v34 = vld [vmem:[%s3903_s18 + $0x80] sm:$0xff] }
 0x3aa   :  { %v1591_v45 = vadd.f32 %v1590_v42, %v813_v35  ;;  %v1632_v47 = vadd.f32 %v1631_v43, %v821_v36  ;;  %v2600_v35 = vld [vmem:[%s3903_s18] sm:$0xff] }
 0x3ab   :  { %v1592_v49 = vpop.f32.mrf.mxu0  ;;  %v1633_v50 = vpop.f32.mrf.mxu1 }
 0x3ac   :  { %v1593_v48 = vadd.f32 %v1592_v49, %v817_v37  ;;  %v1634_v51 = vadd.f32 %v1633_v50, %v825_v38  ;;  %2545 = vmatpush2.bf16.msra.mxu0 %v3386_v40  ;;  %2586 = vmatpush2.bf16.msra.mxu1 %v3389_v41  ;;  %v1642_v46 = vmax.f32 %v1591_v45, 0.0  ;;  %v1644_v11 = vmax.f32 %v1632_v47, 0.0 }
 0x3ad   :  { %v1594_v54 = vpop.f32.mrf.mxu0  ;;  %v1635_v56 = vpop.f32.mrf.mxu1  ;;  %2546 = vmatprep.subr.bf16.mxu0 %v3394_v2  ;;  %2587 = vmatprep.subr.bf16.mxu1 %v3397_v44  ;;  %v1782_v44 = vld [vmem:[%s3902_s17] sm:$0x3] }
 0x3ae   :  { %v1643_v57 = vmax.f32 %v1593_v48, 0.0  ;;  %v1645_v58 = vmax.f32 %v1634_v51, 0.0  ;;  %v1650_v4 = vpack.c.bf16 %v1642_v46, %v1642_v46  ;;  %v1652_v5 = vpack.c.bf16 %v1644_v11, %v1644_v11 }
 0x3af   :  { %v1595_v59 = vpop.f32.mrf.mxu0  ;;  %v1636_v61 = vpop.f32.mrf.mxu1  ;;  %v1787_v45 = vrot.slane %v1782_v44, %v3627_v3  ;;  %v1791_v47 = vrot.slane %v1782_v44, %v3653_v14 }
 0x3b0   :  { %v1651_v62 = vpack.c.bf16 %v1643_v57, %v1643_v57  ;;  %v1653_v63 = vpack.c.bf16 %v1645_v58, %v1645_v58  ;;  %2547 = vmatpush2.bf16.msra.mxu0 %v3392_v52  ;;  %2588 = vmatpush2.bf16.msra.mxu1 %v3395_v53 }
 0x3b1   :  { %3113 = vmatprep.subr.mxu0 %v2631_v6  ;;  %v3102_v6 = vld [vmem:[%s3904_s19] ss:$0 sm:$0xff]  ;;  %s3506_s19 = smov 127  }
 0x3b2   :  { %2548 = vmatprep.mubr.bf16.mxu0 %v1651_v62  ;;  %2589 = vmatprep.mubr.bf16.mxu1 %v1653_v63 }
 0x3b3   :  { %2549 = vmatmul.mubr.bf16.vlgmr.msra.gmra.mxu0 %v1650_v4  ;;  %2590 = vmatmul.mubr.bf16.vlgmr.msra.gmra.mxu1 %v1652_v5 }
 0x3b4   :  { %3114 = vmatpush3.msra.mxu0 %v2615_v7 }
 0x3b5   :  { %3115 = vmatprep.subr.mxu0 %v2630_v55 }
 0x3b6   :  { %3116 = vmatpush3.msra.mxu0 %v2614_v8 }
 0x3b7   :  { %3117 = vmatprep.subr.mxu0 %v2629_v9 }
 0x3b8   :  { %3118 = vmatpush3.msra.mxu0 %v2613_v10 }
 0x3b9   :  { %3119 = vmatprep.subr.mxu0 %v2628_v12 }
 0x3ba   :  { %3120 = vmatpush3.msra.mxu0 %v2612_v13 }
 0x3bb   :  { %3121 = vmatprep.subr.mxu0 %v2627_v15 }
 0x3bc   :  { %3122 = vmatpush3.msra.mxu0 %v2611_v16 }
 0x3bd   :  { %3123 = vmatprep.subr.mxu0 %v2626_v17 }
 0x3be   :  { %3124 = vmatpush3.msra.mxu0 %v2610_v28 }
 0x3bf   :  { %3125 = vmatprep.subr.mxu0 %v2625_v60 }
 0x3c0   :  { %3126 = vmatpush3.msra.mxu0 %v2609_v18 }
 0x3c1   :  { %3127 = vmatprep.subr.mxu0 %v2624_v20  ;;  %v2720_v20 = vld [vmem:[%s3898_s13] sm:$0xff] }
 0x3c2   :  { %3128 = vmatpush3.msra.mxu0 %v2608_v22  ;;  %v2723_v22 = vsel %vm2722_vm13, %v2720_v20, 0.0  ;;  %vm2734_vm14 = vcmp.gt.f32.partialorder %v2720_v20, 0.5 }
 0x3c3   :  { %3129 = vmatprep.subr.mxu0 %v2623_v23 }
 0x3c4   :  { %3130 = vmatpush3.msra.mxu0 %v2607_v24  ;;  %v2721_v24 = vld [vmem:[%s3897_s12] sm:$0xff] }
 0x3c5   :  { %3131 = vmatprep.subr.mxu0 %v2622_v25  ;;  %vm2766_vm15 = vcmp.gt.f32.partialorder %v2721_v24, 0.5 }
 0x3c6   :  { %3132 = vmatpush3.msra.mxu0 %v2606_v26  ;;  %v2754_v26 = vsel %vm2722_vm13, %v2721_v24, -inf }
 0x3c7   :  { %3133 = vmatprep.subr.mxu0 %v2621_v0 }
 0x3c8   :  { %3134 = vmatpush3.msra.mxu0 %v2605_v27 }
 0x3c9   :  { %3135 = vmatprep.subr.mxu0 %v2620_v19 }
 0x3ca   :  { %3136 = vmatpush3.msra.mxu0 %v2604_v29 }
 0x3cb   :  { %3137 = vmatprep.subr.mxu0 %v2619_v30 }
 0x3cc   :  { %3138 = vmatpush3.msra.mxu0 %v2603_v31 }
 0x3cd   :  { %3139 = vmatprep.subr.mxu0 %v2618_v39 }
 0x3ce   :  { %3140 = vmatpush3.msra.mxu0 %v2602_v32 }
 0x3cf   :  { %3141 = vmatprep.subr.mxu0 %v2617_v33 }
 0x3d0   :  { %3142 = vmatpush3.msra.mxu0 %v2601_v21 }
 0x3d1   :  { %3143 = vmatprep.subr.mxu0 %v2616_v34 }
 0x3d2   :  { %3144 = vmatpush3.msra.mxu0 %v2600_v35 }
 0x433   :  { %v2468_v36 = vpop.f32.mrf.mxu0  ;;  %v2509_v37 = vpop.f32.mrf.mxu1 }
 0x434   :  { %v2469_v49 = vadd.f32 %v2468_v36, %v1787_v45 }
 0x435   :  { %v2470_v38 = vpop.f32.mrf.mxu0  ;;  %v2511_v40 = vpop.f32.mrf.mxu1 }
 0x436   :  { %v2471_v50 = vadd.f32 %v2470_v38, %v1791_v47  ;;  %v2510_v48 = vadd.f32 %v2509_v37, %v2469_v49 }
 0x437   :  { %v2472_v41 = vpop.f32.mrf.mxu0  ;;  %v2513_v42 = vpop.f32.mrf.mxu1 }
 0x438   :  { %v2512_v53 = vadd.f32 %v2511_v40, %v2471_v50 }
 0x439   :  { %v2473_v43 = vpop.f32.mrf.mxu0  ;;  %v2514_v2 = vpop.f32.mrf.mxu1 }
 0x473   :  { %v2550_v51 = vpop.f32.mrf.mxu0  ;;  %v2591_v52 = vpop.f32.mrf.mxu1 }
 0x474   :  { %v2551_v46 = vadd.f32 %v2550_v51, %v2510_v48 }
 0x475   :  { %v2552_v11 = vpop.f32.mrf.mxu0  ;;  %v2593_v54 = vpop.f32.mrf.mxu1 }
 0x476   :  { %v2553_v56 = vadd.f32 %v2552_v11, %v2512_v53  ;;  %v2592_v57 = vadd.f32 %v2591_v52, %v2551_v46 }
 0x477   :  { %v2554_v58 = vpop.f32.mrf.mxu0  ;;  %v2595_v59 = vpop.f32.mrf.mxu1 }
 0x478   :  { %v2594_v61 = vadd.f32 %v2593_v54, %v2553_v56  ;;  %v2598_v3 = vmax.f32 %v2592_v57, 0.0 }
 0x479   :  { %v2555_v62 = vpop.f32.mrf.mxu0  ;;  %v2596_v63 = vpop.f32.mrf.mxu1 }
 0x47a   :  { %v2599_v4 = vmax.f32 %v2594_v61, 0.0 }
 0x47c   :  { %2703 = vmatprep.mubr.f32.mxu0 %v2599_v4 }
 0x47d   :  { %2704 = vmatmul.mubr.f32.vlgmr.msra.gmra.mxu0 %v2598_v3 }
 0x53d   :  { %v3145_v14 = vpop.f32.mrf.mxu0 }
 0x53f   :  { %v3146_v5 = vpop.f32.mrf.mxu0 }
 0x540   :  { %v3147_v7 = vadd.f32 %v3146_v5, %v3145_v14 }
 0x542   :  { %v2706_v55 = vadd.f32 %v3147_v7, %v3102_v6 }
 0x544   :  { %v2709_v8 = vsel %vm481_vm8, %v2706_v55, -inf }
 0x545   :  { %2710 = vmax.xlane.f32.xlu0 %v2709_v8 }
 0x5ce   :  { %v2711_v9 = vpop.xlane.xlu0 %2710 }
 0x5cf   :  { %v2712_v10 = vsub.f32 %v2706_v55, %v2711_v9 }
 0x5d1   :  { %v2713_v12 = vmul.f32 1.442695, %v2712_v10  ;;  %v2802_v10 = vand.u32 127, %v98_v1 }
 0x5d3   :  { %3416 = vpow2.f32 %v2713_v12  ;;  %vm2804_vm1 = vcmp.eq.s32.totalorder %v2802_v10, 1  ;;  %vm2803_vm2 = vcmp.eq.s32.totalorder %v2802_v10, 0 }
 0x5e0   :  { %v3417_v13 = vpop.eup %3416 }
 0x5e1   :  { %v2715_v15 = vsel %vm481_vm8, %v3417_v13, 0.0 }
 0x5e2   :  { %2716 = vadd.xlane.f32.xlu1 %v2715_v15 }
 0x66b   :  { %v2717_v16 = vpop.xlane.xlu1 %2716 }
 0x66c   :  { %3418 = vrcp.f32 %v2717_v16 }
 0x679   :  { %v3419_v17 = vpop.eup %3418 }
 0x67a   :  { %v2719_v28 = vmul.f32 %v3419_v17, %v3417_v13 }
 0x67c   :  { %2784 = vrot.lane.b32.xlu1 %v2719_v28, %s3505_s30  ;;  %2768 = vrot.lane.b32.xlu0 %v2719_v28, %s3506_s19  ;;  %v2735_v60 = vmax.f32 %v2719_v28, 1e-30 }
 0x67e   :  { %3420 = vlog2.f32 %v2735_v60 }
 0x68b   :  { %v3421_v18 = vpop.eup %3420 }
 0x68c   :  { %v2737_v23 = vmul.f32 0.6931472, %v3421_v18 }
 0x68e   :  { %v2738_v25 = vsel %vm2734_vm14, %v2737_v23, 0.0 }
 0x68f   :  { %v2739_v0 = vsel %vm2722_vm13, %v2738_v25, 0.0 }
 0x69b   :  { %2724 = vadd.xlane.f32.xlu0 %v2723_v22 }
 0x69f   :  { %2755 = vmax.xlane.f32.xlu0 %v2754_v26 }
 0x6a0   :  { %2740 = vadd.xlane.f32.xlu1 %v2739_v0 }
 0x6ee   :  { %v2785_v27 = vpop.permute.xlu1 %2784  ;;  %v2769_v19 = vpop.permute.xlu0 %2768 }
 0x6ef   :  { %v2787_v29 = vsel %vm2734_vm14, %v2785_v27, -1.0  ;;  %v2771_v30 = vsel %vm2766_vm15, %v2769_v19, -1.0 }
 0x6f0   :  { %v2772_v31 = vsel %vm2722_vm13, %v2771_v30, -inf  ;;  %v2788_v39 = vsel %vm2722_vm13, %v2787_v29, -inf }
 0x6f1   :  { %2773 = vmax.xlane.f32.xlu0 %v2772_v31  ;;  %2789 = vmax.xlane.f32.xlu1 %v2788_v39 }
 0x724   :  { %v2725_v32 = vpop.xlane.xlu0 %2724 }
 0x725   :  { %v2726_v33 = vrot.slane %v2725_v32, 4 }
 0x727   :  { %v2727_v21 = vadd.f32 %v2726_v33, %v2725_v32 }
 0x728   :  { %v2756_v34 = vpop.xlane.xlu0 %2755 }
 0x729   :  { %v2728_v35 = vrot.slane %v2727_v21, 2  ;;  %v2741_v36 = vpop.xlane.xlu1 %2740  ;;  %v2757_v37 = vrot.slane %v2756_v34, 4 }
 0x72a   :  { %v2742_v38 = vrot.slane %v2741_v36, 4 }
 0x72b   :  { %v2729_v40 = vadd.f32 %v2728_v35, %v2727_v21  ;;  %v2758_v41 = vmax.f32 %v2756_v34, %v2757_v37 }
 0x72c   :  { %v2743_v42 = vadd.f32 %v2742_v38, %v2741_v36 }
 0x72d   :  { %v2730_v43 = vrot.slane %v2729_v40, 1  ;;  %v2759_v2 = vrot.slane %v2758_v41, 2 }
 0x72e   :  { %v2744_v44 = vrot.slane %v2743_v42, 2 }
 0x72f   :  { %v2731_v45 = vadd.f32 %v2730_v43, %v2729_v40  ;;  %v2760_v47 = vmax.f32 %v2758_v41, %v2759_v2 }
 0x730   :  { %v2745_v49 = vadd.f32 %v2744_v44, %v2743_v42 }
 0x731   :  { %3172 = vpush %v2731_v45  ;;  %v2761_v50 = vrot.slane %v2760_v47, 1 }
 0x732   :  { %v2746_v48 = vrot.slane %v2745_v49, 1 }
 0x733   :  { %v2762_v51 = vmax.f32 %v2760_v47, %v2761_v50 }
 0x734   :  { %v2747_v52 = vadd.f32 %v2746_v48, %v2745_v49 }
 0x736   :  { %3174 = vpush %v2747_v52 }
 0x737   :  { %3176 = vpush %v2762_v51 }
 0x762   :  { %s3173_s12 = spop %3172 }
 0x763   :  { %v2733_v5 = vstv %s3173_s12 }
 0x764   :  { %3422 = vrcp.f32 %v2733_v5 }
 0x767   :  { %s3175_s13 = spop %3174 }
 0x768   :  { %v2749_v7 = vstv %s3175_s13  ;;  %s3177_s16 = spop %3176 }
 0x769   :  { %v2764_v9 = vstv %s3177_s16 }
 0x76a   :  { %vm2765_vm0 = vcmp.gt.f32.partialorder %v2764_v9, 0.5 }
 0x771   :  { %v3423_v6 = vpop.eup %3422 }
 0x772   :  { %v2751_v55 = vmul.f32 %v3423_v6, %v2749_v7 }
 0x774   :  { %v2752_v8 = vmul.f32 1.442695, %v2751_v55 }
 0x776   :  { %3424 = vpow2.f32 %v2752_v8 }
 0x77a   :  { %v2774_v53 = vpop.xlane.xlu0 %2773  ;;  %v2790_v46 = vpop.xlane.xlu1 %2789 }
 0x77b   :  { %v2775_v11 = vrot.slane %v2774_v53, 4  ;;  %v2791_v54 = vrot.slane %v2790_v46, 4 }
 0x77d   :  { %v2776_v56 = vmax.f32 %v2774_v53, %v2775_v11  ;;  %v2792_v57 = vmax.f32 %v2790_v46, %v2791_v54 }
 0x77f   :  { %v2777_v58 = vrot.slane %v2776_v56, 2  ;;  %v2793_v59 = vrot.slane %v2792_v57, 2 }
 0x781   :  { %v2794_v61 = vmax.f32 %v2792_v57, %v2793_v59  ;;  %v2778_v62 = vmax.f32 %v2776_v56, %v2777_v58 }
 0x783   :  { %v2779_v63 = vrot.slane %v2778_v62, 1  ;;  %v2795_v4 = vrot.slane %v2794_v61, 1  ;;  %v3425_v28 = vpop.eup %3424 }
 0x785   :  { %v2780_v3 = vmax.f32 %v2778_v62, %v2779_v63  ;;  %v2796_v14 = vmax.f32 %v2794_v61, %v2795_v4 }
 0x787   :  { %3178 = vpush %v2780_v3 }
 0x788   :  { %3180 = vpush %v2796_v14 }
 0x7b8   :  { %s3179_s10 = spop %3178 }
 0x7b9   :  { %v2782_v12 = vstv %s3179_s10  ;;  %s3181_s11 = spop %3180 }
 0x7ba   :  { %v2783_v13 = vsel %vm2765_vm0, %v2782_v12, 0.0  ;;  %v2798_v16 = vstv %s3181_s11 }
 0x7bb   :  { %v2799_v15 = vsub.f32 1.0, %v2783_v13 }
 0x7bd   :  { %v2800_v17 = vmul.f32 %v2799_v15, %v2798_v16 }
 0x7bf   :  { %v2805_v60 = vsel %vm2804_vm1, %v2783_v13, %v2800_v17 }
 0x7c0   :  { %v2806_v18 = vsel %vm2803_vm2, %v3425_v28, %v2805_v60 }
 0x7c1   :  { %v2808_v20 = vsel %vm2807_vm3, %v2806_v18, 0.0 }
 0x7c2   :  { %2809 = vadd.xlane.f32.xlu0 %v2808_v20 }
 0x84b   :  { %v2810_v22 = vpop.xlane.xlu0 %2809 }
 0x84c   :  { %v2811_v23 = vrot.slane %v2810_v22, 4 }
 0x84e   :  { %v2812_v24 = vadd.f32 %v2811_v23, %v2810_v22 }
 0x850   :  { %v2813_v1 = vrot.slane %v2812_v24, 2 }
 0x852   :  { %v2814_v25 = vadd.f32 %v2813_v1, %v2812_v24 }
 0x854   :  { %v2815_v26 = vrot.slane %v2814_v25, 1 }
 0x856   :  { %v2816_v0 = vadd.f32 %v2815_v26, %v2814_v25 }
 0x858   :  { %3182 = vpush %v2816_v0 }
 0x889   :  { %s3183_s8 = spop %3182 }
 0x88a   :  { %v2818_v27 = vstv %s3183_s8 }
 0x88b   :  { %3426 = vrcp.f32 %v2818_v27 }
 0x898   :  { %v3427_v19 = vpop.eup %3426 }
 0x899   :  { %v2820_v29 = vmul.f32 %v3427_v19, %v2806_v18 }
 0x89b   :  { %2821 = vst.msk [vmem:[#allocation7] sm:$0x1] %vm2807_vm3, %v2820_v29 }
 0x89c   :  { %3479 = shalt.err (!%p3476_p0)
}
 0x89d   :  { %2831 = dma.vmem_to_hbm [thread:$0]  %s2829_s21, 16, %s3905_s20, [#allocation4]  }
 0x89e   :  { %3492 = dma.done.wait [#allocation4], 16  }
 0x89f   :  { %3493 = vsyncadd [#allocation4], 4294967280 }
 0x8a0   :  { %2835 = vsyncpa [#allocation3], 1 }
 0x8a1   :  { %2836 = vsyncpa [#allocation6], 1 }
 0x8a2   :  { %2837 = vsyncpa [#allocation4], 1 }

</bundles_post_ra>
